<compile_context>
chip_gen: v6e
topology: v6e:2x2x1
jax: 0.10.0
libtpu: 0.0.40
codegen_flags: <defaults>
</compile_context>

<pallas_src>
import jax
import jax.numpy as jnp
from jax import lax
from jax.experimental import pallas as pl
from jax.experimental.pallas import tpu as pltpu

# ---- problem sizes (from the torch module) ----
INPUT_SIZE = 5
HIDDEN_SIZE = 10
OUT_SIZE = 1

# ---- padded sizes for TPU layouts ----
B_PAD = 8      # batch padded to sublane multiple
LANES = 128    # everything (input feats, packed gates, hidden, fc out) lives in 128 lanes

# Packed gate lane-block order is [i | f | o | g] (width HIDDEN_SIZE each);
# PyTorch's stacked row-block order is [i | f | g | o].
_GATE_PERM = (0, 1, 3, 2)


def lstm_kernel(x_ref, wih_ref, whh_ref, b_ref, wfc_ref, bfc_ref, out_ref):
    """Full LSTM recurrence + final Linear, all in VMEM, packed-gate layout.

    x_ref   : (T*B_PAD, LANES)  time-major padded input (lanes 0-4 real)
    wih_ref : (LANES, LANES)    input->gates  (rows 0-4 real, packed [i|f|o|g] lanes)
    whh_ref : (LANES, LANES)    hidden->gates (rows 0-9 real, packed lanes)
    b_ref   : (1, LANES)        b_ih + b_hh combined, packed lanes
    wfc_ref : (LANES, LANES)    fc weight (rows 0-9 real, col 0 real)
    bfc_ref : (1, LANES)        fc bias (lane 0 real)
    out_ref : (B_PAD, LANES)
    """
    H = HIDDEN_SIZE
    n_steps = x_ref.shape[0] // B_PAD  # static (T)

    # (1) Hoisted input projection + combined bias: one MXU matmul, kept as a
    #     traced value (8 vregs) -- no VMEM scratch round-trip.
    xproj = (jnp.dot(x_ref[...], wih_ref[...],
                     preferred_element_type=jnp.float32) + b_ref[...])

    # Lane mask: lanes < 3H (i, f, o) get sigmoid; the rest get tanh.
    lane = lax.broadcasted_iota(jnp.int32, (B_PAD, LANES), 1)
    is_sig = lane < 3 * H

    # (2) Serial recurrence, fully unrolled (T static); h/c live in vregs.
    #     Zero-padding invariant: h and c stay exactly 0 on lanes >= H.
    h = jnp.zeros((B_PAD, LANES), jnp.float32)
    c = jnp.zeros((B_PAD, LANES), jnp.float32)
    for t in range(n_steps):
        # Single 128x128 weight tile per step.
        gates = (xproj[t * B_PAD:(t + 1) * B_PAD, :]
                 + jnp.dot(h, whh_ref[...], preferred_element_type=jnp.float32))

        # Single-EUP activation over the packed gate vreg:
        #   sigmoid(x) = 0.5 * tanh(0.5 * x) + 0.5  (lanes < 3H), tanh elsewhere.
        th = jnp.tanh(jnp.where(is_sig, 0.5 * gates, gates))
        act = jnp.where(is_sig, 0.5 * th + 0.5, th)
        # act lanes: [0:H)=i, [H:2H)=f, [2H:3H)=o, [3H:4H)=g, [4H:) = 0

        # Align f / o / g onto lanes 0..H-1 (lane rotations; XLU path).
        f_g = jnp.roll(act, -H, axis=1)
        o_g = jnp.roll(act, -2 * H, axis=1)
        g_g = jnp.roll(act, -3 * H, axis=1)

        # Padded lanes stay 0: c, tanh(0)=0 and the rolled junk lanes always
        # multiply against zeros (verified against the packed layout).
        c = f_g * c + act * g_g          # act supplies i on lanes 0..H-1
        h = o_g * jnp.tanh(c)

    # (3) Final Linear on the last hidden state.
    out_ref[...] = (jnp.dot(h, wfc_ref[...], preferred_element_type=jnp.float32)
                    + bfc_ref[...])


def pack_params(params):
    """Pad & repack PyTorch-layout LSTM/Linear params ONCE (outside the jitted
    forward) into the single-block [i|f|o|g] lane-packed layout."""
    w_ih, w_hh = params["w_ih"], params["w_hh"]
    b_ih, b_hh = params["b_ih"], params["b_hh"]
    w_fc, b_fc = params["w_fc"], params["b_fc"]
    H = HIDDEN_SIZE

    def pack_gate_mat(w):
        # w: (4H, in_dim) torch layout -> (LANES, LANES) transposed, lane-packed
        in_dim = w.shape[1]
        out = jnp.zeros((LANES, LANES), jnp.float32)
        for p, gk in enumerate(_GATE_PERM):
            blk = w[gk * H:(gk + 1) * H, :]            # (H, in_dim)
            out = out.at[:in_dim, p * H:(p + 1) * H].set(blk.T)
        return out

    def pack_gate_bias(b):
        out = jnp.zeros((1, LANES), jnp.float32)
        for p, gk in enumerate(_GATE_PERM):
            out = out.at[0, p * H:(p + 1) * H].set(b[gk * H:(gk + 1) * H])
        return out

    return {
        "wih": pack_gate_mat(w_ih),                              # (128, 128)
        "whh": pack_gate_mat(w_hh),                              # (128, 128)
        "b": pack_gate_bias(b_ih) + pack_gate_bias(b_hh),        # (1, 128)
        "wfc": jnp.zeros((LANES, LANES), jnp.float32)
               .at[:H, :OUT_SIZE].set(w_fc.T),                   # (128, 128)
        "bfc": jnp.zeros((1, LANES), jnp.float32)
               .at[0, :OUT_SIZE].set(b_fc),                      # (1, 128)
    }


@jax.jit
def simple_lstm_forward(x, packed):
    """x: (B, T, INPUT_SIZE) float32 (batch_first, like the torch module)."""
    B, T, I = x.shape

    # Time-major zero-padded slab (T*B_PAD, LANES) = 32 KiB; built in the
    # jitted wrapper so every in-kernel shape stays (8,128)-tile aligned.
    x_tm = jnp.transpose(x, (1, 0, 2))  # (T, B, I)
    x_slab = (jnp.zeros((T, B_PAD, LANES), jnp.float32)
              .at[:, :B, :I].set(x_tm)
              .reshape(T * B_PAD, LANES))

    vmem = pl.BlockSpec(memory_space=pltpu.MemorySpace.VMEM)
    out_pad = pl.pallas_call(
        lstm_kernel,
        out_shape=jax.ShapeDtypeStruct((B_PAD, LANES), jnp.float32),
        in_specs=[vmem] * 6,
        out_specs=vmem,
    )(x_slab, packed["wih"], packed["whh"], packed["b"],
      packed["wfc"], packed["bfc"])

    return out_pad[:B, :OUT_SIZE]  # (B, 1)


def _reference(x, params):
    """Pure-JAX reference matching torch.nn.LSTM + Linear semantics."""
    w_ih, w_hh, b_ih, b_hh, w_fc, b_fc = (
        params["w_ih"], params["w_hh"], params["b_ih"], params["b_hh"],
        params["w_fc"], params["b_fc"])
    B, T, _ = x.shape
    h = jnp.zeros((B, HIDDEN_SIZE), jnp.float32)
    c = jnp.zeros((B, HIDDEN_SIZE), jnp.float32)

    def step(carry, x_t):
        h, c = carry
        gates = x_t @ w_ih.T + b_ih + h @ w_hh.T + b_hh
        i_g, f_g, g_g, o_g = jnp.split(gates, 4, axis=-1)
        i_g = jax.nn.sigmoid(i_g)
        f_g = jax.nn.sigmoid(f_g)
        g_g = jnp.tanh(g_g)
        o_g = jax.nn.sigmoid(o_g)
        c = f_g * c + i_g * g_g
        h = o_g * jnp.tanh(c)
        return (h, c), None

    (h, _), _ = lax.scan(step, (h, c), jnp.transpose(x, (1, 0, 2)))
    return h @ w_fc.T + b_fc


def init_params(key):
    """Deterministic init mirroring PyTorch default U(-1/sqrt(H), 1/sqrt(H))."""
    ks = jax.random.split(key, 6)
    bound = 1.0 / jnp.sqrt(jnp.float32(HIDDEN_SIZE))
    u = lambda k, shape: jax.random.uniform(k, shape, jnp.float32, -bound, bound)
    return {
        "w_ih": u(ks[0], (4 * HIDDEN_SIZE, INPUT_SIZE)),
        "w_hh": u(ks[1], (4 * HIDDEN_SIZE, HIDDEN_SIZE)),
        "b_ih": u(ks[2], (4 * HIDDEN_SIZE,)),
        "b_hh": u(ks[3], (4 * HIDDEN_SIZE,)),
        "w_fc": u(ks[4], (OUT_SIZE, HIDDEN_SIZE)),
        "b_fc": u(ks[5], (OUT_SIZE,)),
    }


if __name__ == "__main__":
    key = jax.random.PRNGKey(0)
    k_param, k_x = jax.random.split(key)
    params = init_params(k_param)
    packed = pack_params(params)          # one-time weight repack (outside jit path)

    B, T = 2, 8
    x = jax.random.normal(k_x, (B, T, INPUT_SIZE), jnp.float32)

    out = simple_lstm_forward(x, packed)
    out = jax.block_until_ready(out)

    ref = jax.block_until_ready(_reference(x, params))
    assert out.shape == (B, OUT_SIZE)
    assert jnp.allclose(out, ref, atol=1e-5, rtol=1e-5), (out, ref)

    print("KERNEL_OK")
</pallas_src>

<mosaic_0001>
module attributes {stable_mosaic.version = 11 : i64} {
  func.func @lstm_kernel(%arg0: memref<64x128xf32, #tpu.memory_space<vmem>>, %arg1: memref<128x128xf32, #tpu.memory_space<vmem>>, %arg2: memref<128x128xf32, #tpu.memory_space<vmem>>, %arg3: memref<1x128xf32, #tpu.memory_space<vmem>>, %arg4: memref<128x128xf32, #tpu.memory_space<vmem>>, %arg5: memref<1x128xf32, #tpu.memory_space<vmem>>, %arg6: memref<8x128xf32, #tpu.memory_space<vmem>>) attributes {dimension_semantics = [], scalar_prefetch = 0 : i64, scratch_operands = 0 : i64, tpu.core_type = #tpu.core_type<tc>} {
    %c0 = arith.constant 0 : index
    %c0_0 = arith.constant 0 : index
    %0 = vector.load %arg0[%c0, %c0_0] : memref<64x128xf32, #tpu.memory_space<vmem>>, vector<64x128xf32>
    %c0_1 = arith.constant 0 : index
    %c0_2 = arith.constant 0 : index
    %1 = vector.load %arg1[%c0_1, %c0_2] : memref<128x128xf32, #tpu.memory_space<vmem>>, vector<128x128xf32>
    %cst = arith.constant dense<0.000000e+00> : vector<64x128xf32>
    %2 = tpu.matmul %0, %1, %cst {dimension_numbers = #tpu.dot_dimension_numbers<[1], [0], [0], [1], [0, 0, 1, 1], [], []>} : vector<64x128xf32>, vector<128x128xf32>, vector<64x128xf32> -> vector<64x128xf32>
    %c0_3 = arith.constant 0 : index
    %c0_4 = arith.constant 0 : index
    %3 = vector.load %arg3[%c0_3, %c0_4] : memref<1x128xf32, #tpu.memory_space<vmem>>, vector<1x128xf32>
    %4 = vector.broadcast %3 : vector<1x128xf32> to vector<64x128xf32>
    %5 = arith.addf %2, %4 : vector<64x128xf32>
    %6 = tpu.iota {dimensions = array<i32: 1>} : vector<8x128xi32>
    %c30_i32 = arith.constant 30 : i32
    %7 = vector.broadcast %c30_i32 : i32 to vector<8x128xi32>
    %8 = arith.cmpi slt, %6, %7 : vector<8x128xi32>
    %cst_5 = arith.constant 0.000000e+00 : f32
    %9 = vector.broadcast %cst_5 : f32 to vector<8x128xf32>
    %cst_6 = arith.constant 0.000000e+00 : f32
    %10 = vector.broadcast %cst_6 : f32 to vector<8x128xf32>
    %11 = vector.extract_strided_slice %5 {offsets = [0, 0], sizes = [8, 128], strides = [1, 1]} : vector<64x128xf32> to vector<8x128xf32>
    %c0_7 = arith.constant 0 : index
    %c0_8 = arith.constant 0 : index
    %12 = vector.load %arg2[%c0_7, %c0_8] : memref<128x128xf32, #tpu.memory_space<vmem>>, vector<128x128xf32>
    %cst_9 = arith.constant dense<0.000000e+00> : vector<8x128xf32>
    %13 = tpu.matmul %9, %12, %cst_9 {dimension_numbers = #tpu.dot_dimension_numbers<[1], [0], [0], [1], [0, 0, 1, 1], [], []>} : vector<8x128xf32>, vector<128x128xf32>, vector<8x128xf32> -> vector<8x128xf32>
    %14 = arith.addf %11, %13 : vector<8x128xf32>
    %cst_10 = arith.constant 5.000000e-01 : f32
    %15 = vector.broadcast %cst_10 : f32 to vector<8x128xf32>
    %16 = arith.mulf %15, %14 : vector<8x128xf32>
    %17 = arith.select %8, %16, %14 : vector<8x128xi1>, vector<8x128xf32>
    %18 = math.tanh %17 : vector<8x128xf32>
    %cst_11 = arith.constant 5.000000e-01 : f32
    %19 = vector.broadcast %cst_11 : f32 to vector<8x128xf32>
    %20 = arith.mulf %19, %18 : vector<8x128xf32>
    %cst_12 = arith.constant 5.000000e-01 : f32
    %21 = vector.broadcast %cst_12 : f32 to vector<8x128xf32>
    %22 = arith.addf %20, %21 : vector<8x128xf32>
    %23 = arith.select %8, %22, %18 : vector<8x128xi1>, vector<8x128xf32>
    %24 = vector.extract_strided_slice %23 {offsets = [0, 10], sizes = [8, 118], strides = [1, 1]} : vector<8x128xf32> to vector<8x118xf32>
    %25 = vector.extract_strided_slice %23 {offsets = [0, 0], sizes = [8, 10], strides = [1, 1]} : vector<8x128xf32> to vector<8x10xf32>
    %26 = tpu.concatenate %24, %25 in 1 : vector<8x118xf32>, vector<8x10xf32> -> vector<8x128xf32>
    %27 = vector.extract_strided_slice %23 {offsets = [0, 20], sizes = [8, 108], strides = [1, 1]} : vector<8x128xf32> to vector<8x108xf32>
    %28 = vector.extract_strided_slice %23 {offsets = [0, 0], sizes = [8, 20], strides = [1, 1]} : vector<8x128xf32> to vector<8x20xf32>
    %29 = tpu.concatenate %27, %28 in 1 : vector<8x108xf32>, vector<8x20xf32> -> vector<8x128xf32>
    %30 = vector.extract_strided_slice %23 {offsets = [0, 30], sizes = [8, 98], strides = [1, 1]} : vector<8x128xf32> to vector<8x98xf32>
    %31 = vector.extract_strided_slice %23 {offsets = [0, 0], sizes = [8, 30], strides = [1, 1]} : vector<8x128xf32> to vector<8x30xf32>
    %32 = tpu.concatenate %30, %31 in 1 : vector<8x98xf32>, vector<8x30xf32> -> vector<8x128xf32>
    %33 = arith.mulf %26, %10 : vector<8x128xf32>
    %34 = arith.mulf %23, %32 : vector<8x128xf32>
    %35 = arith.addf %33, %34 : vector<8x128xf32>
    %36 = math.tanh %35 : vector<8x128xf32>
    %37 = arith.mulf %29, %36 : vector<8x128xf32>
    %38 = vector.extract_strided_slice %5 {offsets = [8, 0], sizes = [8, 128], strides = [1, 1]} : vector<64x128xf32> to vector<8x128xf32>
    %c0_13 = arith.constant 0 : index
    %c0_14 = arith.constant 0 : index
    %39 = vector.load %arg2[%c0_13, %c0_14] : memref<128x128xf32, #tpu.memory_space<vmem>>, vector<128x128xf32>
    %cst_15 = arith.constant dense<0.000000e+00> : vector<8x128xf32>
    %40 = tpu.matmul %37, %39, %cst_15 {dimension_numbers = #tpu.dot_dimension_numbers<[1], [0], [0], [1], [0, 0, 1, 1], [], []>} : vector<8x128xf32>, vector<128x128xf32>, vector<8x128xf32> -> vector<8x128xf32>
    %41 = arith.addf %38, %40 : vector<8x128xf32>
    %cst_16 = arith.constant 5.000000e-01 : f32
    %42 = vector.broadcast %cst_16 : f32 to vector<8x128xf32>
    %43 = arith.mulf %42, %41 : vector<8x128xf32>
    %44 = arith.select %8, %43, %41 : vector<8x128xi1>, vector<8x128xf32>
    %45 = math.tanh %44 : vector<8x128xf32>
    %cst_17 = arith.constant 5.000000e-01 : f32
    %46 = vector.broadcast %cst_17 : f32 to vector<8x128xf32>
    %47 = arith.mulf %46, %45 : vector<8x128xf32>
    %cst_18 = arith.constant 5.000000e-01 : f32
    %48 = vector.broadcast %cst_18 : f32 to vector<8x128xf32>
    %49 = arith.addf %47, %48 : vector<8x128xf32>
    %50 = arith.select %8, %49, %45 : vector<8x128xi1>, vector<8x128xf32>
    %51 = vector.extract_strided_slice %50 {offsets = [0, 10], sizes = [8, 118], strides = [1, 1]} : vector<8x128xf32> to vector<8x118xf32>
    %52 = vector.extract_strided_slice %50 {offsets = [0, 0], sizes = [8, 10], strides = [1, 1]} : vector<8x128xf32> to vector<8x10xf32>
    %53 = tpu.concatenate %51, %52 in 1 : vector<8x118xf32>, vector<8x10xf32> -> vector<8x128xf32>
    %54 = vector.extract_strided_slice %50 {offsets = [0, 20], sizes = [8, 108], strides = [1, 1]} : vector<8x128xf32> to vector<8x108xf32>
    %55 = vector.extract_strided_slice %50 {offsets = [0, 0], sizes = [8, 20], strides = [1, 1]} : vector<8x128xf32> to vector<8x20xf32>
    %56 = tpu.concatenate %54, %55 in 1 : vector<8x108xf32>, vector<8x20xf32> -> vector<8x128xf32>
    %57 = vector.extract_strided_slice %50 {offsets = [0, 30], sizes = [8, 98], strides = [1, 1]} : vector<8x128xf32> to vector<8x98xf32>
    %58 = vector.extract_strided_slice %50 {offsets = [0, 0], sizes = [8, 30], strides = [1, 1]} : vector<8x128xf32> to vector<8x30xf32>
    %59 = tpu.concatenate %57, %58 in 1 : vector<8x98xf32>, vector<8x30xf32> -> vector<8x128xf32>
    %60 = arith.mulf %53, %35 : vector<8x128xf32>
    %61 = arith.mulf %50, %59 : vector<8x128xf32>
    %62 = arith.addf %60, %61 : vector<8x128xf32>
    %63 = math.tanh %62 : vector<8x128xf32>
    %64 = arith.mulf %56, %63 : vector<8x128xf32>
    %65 = vector.extract_strided_slice %5 {offsets = [16, 0], sizes = [8, 128], strides = [1, 1]} : vector<64x128xf32> to vector<8x128xf32>
    %c0_19 = arith.constant 0 : index
    %c0_20 = arith.constant 0 : index
    %66 = vector.load %arg2[%c0_19, %c0_20] : memref<128x128xf32, #tpu.memory_space<vmem>>, vector<128x128xf32>
    %cst_21 = arith.constant dense<0.000000e+00> : vector<8x128xf32>
    %67 = tpu.matmul %64, %66, %cst_21 {dimension_numbers = #tpu.dot_dimension_numbers<[1], [0], [0], [1], [0, 0, 1, 1], [], []>} : vector<8x128xf32>, vector<128x128xf32>, vector<8x128xf32> -> vector<8x128xf32>
    %68 = arith.addf %65, %67 : vector<8x128xf32>
    %cst_22 = arith.constant 5.000000e-01 : f32
    %69 = vector.broadcast %cst_22 : f32 to vector<8x128xf32>
    %70 = arith.mulf %69, %68 : vector<8x128xf32>
    %71 = arith.select %8, %70, %68 : vector<8x128xi1>, vector<8x128xf32>
    %72 = math.tanh %71 : vector<8x128xf32>
    %cst_23 = arith.constant 5.000000e-01 : f32
    %73 = vector.broadcast %cst_23 : f32 to vector<8x128xf32>
    %74 = arith.mulf %73, %72 : vector<8x128xf32>
    %cst_24 = arith.constant 5.000000e-01 : f32
    %75 = vector.broadcast %cst_24 : f32 to vector<8x128xf32>
    %76 = arith.addf %74, %75 : vector<8x128xf32>
    %77 = arith.select %8, %76, %72 : vector<8x128xi1>, vector<8x128xf32>
    %78 = vector.extract_strided_slice %77 {offsets = [0, 10], sizes = [8, 118], strides = [1, 1]} : vector<8x128xf32> to vector<8x118xf32>
    %79 = vector.extract_strided_slice %77 {offsets = [0, 0], sizes = [8, 10], strides = [1, 1]} : vector<8x128xf32> to vector<8x10xf32>
    %80 = tpu.concatenate %78, %79 in 1 : vector<8x118xf32>, vector<8x10xf32> -> vector<8x128xf32>
    %81 = vector.extract_strided_slice %77 {offsets = [0, 20], sizes = [8, 108], strides = [1, 1]} : vector<8x128xf32> to vector<8x108xf32>
    %82 = vector.extract_strided_slice %77 {offsets = [0, 0], sizes = [8, 20], strides = [1, 1]} : vector<8x128xf32> to vector<8x20xf32>
    %83 = tpu.concatenate %81, %82 in 1 : vector<8x108xf32>, vector<8x20xf32> -> vector<8x128xf32>
    %84 = vector.extract_strided_slice %77 {offsets = [0, 30], sizes = [8, 98], strides = [1, 1]} : vector<8x128xf32> to vector<8x98xf32>
    %85 = vector.extract_strided_slice %77 {offsets = [0, 0], sizes = [8, 30], strides = [1, 1]} : vector<8x128xf32> to vector<8x30xf32>
    %86 = tpu.concatenate %84, %85 in 1 : vector<8x98xf32>, vector<8x30xf32> -> vector<8x128xf32>
    %87 = arith.mulf %80, %62 : vector<8x128xf32>
    %88 = arith.mulf %77, %86 : vector<8x128xf32>
    %89 = arith.addf %87, %88 : vector<8x128xf32>
    %90 = math.tanh %89 : vector<8x128xf32>
    %91 = arith.mulf %83, %90 : vector<8x128xf32>
    %92 = vector.extract_strided_slice %5 {offsets = [24, 0], sizes = [8, 128], strides = [1, 1]} : vector<64x128xf32> to vector<8x128xf32>
    %c0_25 = arith.constant 0 : index
    %c0_26 = arith.constant 0 : index
    %93 = vector.load %arg2[%c0_25, %c0_26] : memref<128x128xf32, #tpu.memory_space<vmem>>, vector<128x128xf32>
    %cst_27 = arith.constant dense<0.000000e+00> : vector<8x128xf32>
    %94 = tpu.matmul %91, %93, %cst_27 {dimension_numbers = #tpu.dot_dimension_numbers<[1], [0], [0], [1], [0, 0, 1, 1], [], []>} : vector<8x128xf32>, vector<128x128xf32>, vector<8x128xf32> -> vector<8x128xf32>
    %95 = arith.addf %92, %94 : vector<8x128xf32>
    %cst_28 = arith.constant 5.000000e-01 : f32
    %96 = vector.broadcast %cst_28 : f32 to vector<8x128xf32>
    %97 = arith.mulf %96, %95 : vector<8x128xf32>
    %98 = arith.select %8, %97, %95 : vector<8x128xi1>, vector<8x128xf32>
    %99 = math.tanh %98 : vector<8x128xf32>
    %cst_29 = arith.constant 5.000000e-01 : f32
    %100 = vector.broadcast %cst_29 : f32 to vector<8x128xf32>
    %101 = arith.mulf %100, %99 : vector<8x128xf32>
    %cst_30 = arith.constant 5.000000e-01 : f32
    %102 = vector.broadcast %cst_30 : f32 to vector<8x128xf32>
    %103 = arith.addf %101, %102 : vector<8x128xf32>
    %104 = arith.select %8, %103, %99 : vector<8x128xi1>, vector<8x128xf32>
    %105 = vector.extract_strided_slice %104 {offsets = [0, 10], sizes = [8, 118], strides = [1, 1]} : vector<8x128xf32> to vector<8x118xf32>
    %106 = vector.extract_strided_slice %104 {offsets = [0, 0], sizes = [8, 10], strides = [1, 1]} : vector<8x128xf32> to vector<8x10xf32>
    %107 = tpu.concatenate %105, %106 in 1 : vector<8x118xf32>, vector<8x10xf32> -> vector<8x128xf32>
    %108 = vector.extract_strided_slice %104 {offsets = [0, 20], sizes = [8, 108], strides = [1, 1]} : vector<8x128xf32> to vector<8x108xf32>
    %109 = vector.extract_strided_slice %104 {offsets = [0, 0], sizes = [8, 20], strides = [1, 1]} : vector<8x128xf32> to vector<8x20xf32>
    %110 = tpu.concatenate %108, %109 in 1 : vector<8x108xf32>, vector<8x20xf32> -> vector<8x128xf32>
    %111 = vector.extract_strided_slice %104 {offsets = [0, 30], sizes = [8, 98], strides = [1, 1]} : vector<8x128xf32> to vector<8x98xf32>
    %112 = vector.extract_strided_slice %104 {offsets = [0, 0], sizes = [8, 30], strides = [1, 1]} : vector<8x128xf32> to vector<8x30xf32>
    %113 = tpu.concatenate %111, %112 in 1 : vector<8x98xf32>, vector<8x30xf32> -> vector<8x128xf32>
    %114 = arith.mulf %107, %89 : vector<8x128xf32>
    %115 = arith.mulf %104, %113 : vector<8x128xf32>
    %116 = arith.addf %114, %115 : vector<8x128xf32>
    %117 = math.tanh %116 : vector<8x128xf32>
    %118 = arith.mulf %110, %117 : vector<8x128xf32>
    %119 = vector.extract_strided_slice %5 {offsets = [32, 0], sizes = [8, 128], strides = [1, 1]} : vector<64x128xf32> to vector<8x128xf32>
    %c0_31 = arith.constant 0 : index
    %c0_32 = arith.constant 0 : index
    %120 = vector.load %arg2[%c0_31, %c0_32] : memref<128x128xf32, #tpu.memory_space<vmem>>, vector<128x128xf32>
    %cst_33 = arith.constant dense<0.000000e+00> : vector<8x128xf32>
    %121 = tpu.matmul %118, %120, %cst_33 {dimension_numbers = #tpu.dot_dimension_numbers<[1], [0], [0], [1], [0, 0, 1, 1], [], []>} : vector<8x128xf32>, vector<128x128xf32>, vector<8x128xf32> -> vector<8x128xf32>
    %122 = arith.addf %119, %121 : vector<8x128xf32>
    %cst_34 = arith.constant 5.000000e-01 : f32
    %123 = vector.broadcast %cst_34 : f32 to vector<8x128xf32>
    %124 = arith.mulf %123, %122 : vector<8x128xf32>
    %125 = arith.select %8, %124, %122 : vector<8x128xi1>, vector<8x128xf32>
    %126 = math.tanh %125 : vector<8x128xf32>
    %cst_35 = arith.constant 5.000000e-01 : f32
    %127 = vector.broadcast %cst_35 : f32 to vector<8x128xf32>
    %128 = arith.mulf %127, %126 : vector<8x128xf32>
    %cst_36 = arith.constant 5.000000e-01 : f32
    %129 = vector.broadcast %cst_36 : f32 to vector<8x128xf32>
    %130 = arith.addf %128, %129 : vector<8x128xf32>
    %131 = arith.select %8, %130, %126 : vector<8x128xi1>, vector<8x128xf32>
    %132 = vector.extract_strided_slice %131 {offsets = [0, 10], sizes = [8, 118], strides = [1, 1]} : vector<8x128xf32> to vector<8x118xf32>
    %133 = vector.extract_strided_slice %131 {offsets = [0, 0], sizes = [8, 10], strides = [1, 1]} : vector<8x128xf32> to vector<8x10xf32>
    %134 = tpu.concatenate %132, %133 in 1 : vector<8x118xf32>, vector<8x10xf32> -> vector<8x128xf32>
    %135 = vector.extract_strided_slice %131 {offsets = [0, 20], sizes = [8, 108], strides = [1, 1]} : vector<8x128xf32> to vector<8x108xf32>
    %136 = vector.extract_strided_slice %131 {offsets = [0, 0], sizes = [8, 20], strides = [1, 1]} : vector<8x128xf32> to vector<8x20xf32>
    %137 = tpu.concatenate %135, %136 in 1 : vector<8x108xf32>, vector<8x20xf32> -> vector<8x128xf32>
    %138 = vector.extract_strided_slice %131 {offsets = [0, 30], sizes = [8, 98], strides = [1, 1]} : vector<8x128xf32> to vector<8x98xf32>
    %139 = vector.extract_strided_slice %131 {offsets = [0, 0], sizes = [8, 30], strides = [1, 1]} : vector<8x128xf32> to vector<8x30xf32>
    %140 = tpu.concatenate %138, %139 in 1 : vector<8x98xf32>, vector<8x30xf32> -> vector<8x128xf32>
    %141 = arith.mulf %134, %116 : vector<8x128xf32>
    %142 = arith.mulf %131, %140 : vector<8x128xf32>
    %143 = arith.addf %141, %142 : vector<8x128xf32>
    %144 = math.tanh %143 : vector<8x128xf32>
    %145 = arith.mulf %137, %144 : vector<8x128xf32>
    %146 = vector.extract_strided_slice %5 {offsets = [40, 0], sizes = [8, 128], strides = [1, 1]} : vector<64x128xf32> to vector<8x128xf32>
    %c0_37 = arith.constant 0 : index
    %c0_38 = arith.constant 0 : index
    %147 = vector.load %arg2[%c0_37, %c0_38] : memref<128x128xf32, #tpu.memory_space<vmem>>, vector<128x128xf32>
    %cst_39 = arith.constant dense<0.000000e+00> : vector<8x128xf32>
    %148 = tpu.matmul %145, %147, %cst_39 {dimension_numbers = #tpu.dot_dimension_numbers<[1], [0], [0], [1], [0, 0, 1, 1], [], []>} : vector<8x128xf32>, vector<128x128xf32>, vector<8x128xf32> -> vector<8x128xf32>
    %149 = arith.addf %146, %148 : vector<8x128xf32>
    %cst_40 = arith.constant 5.000000e-01 : f32
    %150 = vector.broadcast %cst_40 : f32 to vector<8x128xf32>
    %151 = arith.mulf %150, %149 : vector<8x128xf32>
    %152 = arith.select %8, %151, %149 : vector<8x128xi1>, vector<8x128xf32>
    %153 = math.tanh %152 : vector<8x128xf32>
    %cst_41 = arith.constant 5.000000e-01 : f32
    %154 = vector.broadcast %cst_41 : f32 to vector<8x128xf32>
    %155 = arith.mulf %154, %153 : vector<8x128xf32>
    %cst_42 = arith.constant 5.000000e-01 : f32
    %156 = vector.broadcast %cst_42 : f32 to vector<8x128xf32>
    %157 = arith.addf %155, %156 : vector<8x128xf32>
    %158 = arith.select %8, %157, %153 : vector<8x128xi1>, vector<8x128xf32>
    %159 = vector.extract_strided_slice %158 {offsets = [0, 10], sizes = [8, 118], strides = [1, 1]} : vector<8x128xf32> to vector<8x118xf32>
    %160 = vector.extract_strided_slice %158 {offsets = [0, 0], sizes = [8, 10], strides = [1, 1]} : vector<8x128xf32> to vector<8x10xf32>
    %161 = tpu.concatenate %159, %160 in 1 : vector<8x118xf32>, vector<8x10xf32> -> vector<8x128xf32>
    %162 = vector.extract_strided_slice %158 {offsets = [0, 20], sizes = [8, 108], strides = [1, 1]} : vector<8x128xf32> to vector<8x108xf32>
    %163 = vector.extract_strided_slice %158 {offsets = [0, 0], sizes = [8, 20], strides = [1, 1]} : vector<8x128xf32> to vector<8x20xf32>
    %164 = tpu.concatenate %162, %163 in 1 : vector<8x108xf32>, vector<8x20xf32> -> vector<8x128xf32>
    %165 = vector.extract_strided_slice %158 {offsets = [0, 30], sizes = [8, 98], strides = [1, 1]} : vector<8x128xf32> to vector<8x98xf32>
    %166 = vector.extract_strided_slice %158 {offsets = [0, 0], sizes = [8, 30], strides = [1, 1]} : vector<8x128xf32> to vector<8x30xf32>
    %167 = tpu.concatenate %165, %166 in 1 : vector<8x98xf32>, vector<8x30xf32> -> vector<8x128xf32>
    %168 = arith.mulf %161, %143 : vector<8x128xf32>
    %169 = arith.mulf %158, %167 : vector<8x128xf32>
    %170 = arith.addf %168, %169 : vector<8x128xf32>
    %171 = math.tanh %170 : vector<8x128xf32>
    %172 = arith.mulf %164, %171 : vector<8x128xf32>
    %173 = vector.extract_strided_slice %5 {offsets = [48, 0], sizes = [8, 128], strides = [1, 1]} : vector<64x128xf32> to vector<8x128xf32>
    %c0_43 = arith.constant 0 : index
    %c0_44 = arith.constant 0 : index
    %174 = vector.load %arg2[%c0_43, %c0_44] : memref<128x128xf32, #tpu.memory_space<vmem>>, vector<128x128xf32>
    %cst_45 = arith.constant dense<0.000000e+00> : vector<8x128xf32>
    %175 = tpu.matmul %172, %174, %cst_45 {dimension_numbers = #tpu.dot_dimension_numbers<[1], [0], [0], [1], [0, 0, 1, 1], [], []>} : vector<8x128xf32>, vector<128x128xf32>, vector<8x128xf32> -> vector<8x128xf32>
    %176 = arith.addf %173, %175 : vector<8x128xf32>
    %cst_46 = arith.constant 5.000000e-01 : f32
    %177 = vector.broadcast %cst_46 : f32 to vector<8x128xf32>
    %178 = arith.mulf %177, %176 : vector<8x128xf32>
    %179 = arith.select %8, %178, %176 : vector<8x128xi1>, vector<8x128xf32>
    %180 = math.tanh %179 : vector<8x128xf32>
    %cst_47 = arith.constant 5.000000e-01 : f32
    %181 = vector.broadcast %cst_47 : f32 to vector<8x128xf32>
    %182 = arith.mulf %181, %180 : vector<8x128xf32>
    %cst_48 = arith.constant 5.000000e-01 : f32
    %183 = vector.broadcast %cst_48 : f32 to vector<8x128xf32>
    %184 = arith.addf %182, %183 : vector<8x128xf32>
    %185 = arith.select %8, %184, %180 : vector<8x128xi1>, vector<8x128xf32>
    %186 = vector.extract_strided_slice %185 {offsets = [0, 10], sizes = [8, 118], strides = [1, 1]} : vector<8x128xf32> to vector<8x118xf32>
    %187 = vector.extract_strided_slice %185 {offsets = [0, 0], sizes = [8, 10], strides = [1, 1]} : vector<8x128xf32> to vector<8x10xf32>
    %188 = tpu.concatenate %186, %187 in 1 : vector<8x118xf32>, vector<8x10xf32> -> vector<8x128xf32>
    %189 = vector.extract_strided_slice %185 {offsets = [0, 20], sizes = [8, 108], strides = [1, 1]} : vector<8x128xf32> to vector<8x108xf32>
    %190 = vector.extract_strided_slice %185 {offsets = [0, 0], sizes = [8, 20], strides = [1, 1]} : vector<8x128xf32> to vector<8x20xf32>
    %191 = tpu.concatenate %189, %190 in 1 : vector<8x108xf32>, vector<8x20xf32> -> vector<8x128xf32>
    %192 = vector.extract_strided_slice %185 {offsets = [0, 30], sizes = [8, 98], strides = [1, 1]} : vector<8x128xf32> to vector<8x98xf32>
    %193 = vector.extract_strided_slice %185 {offsets = [0, 0], sizes = [8, 30], strides = [1, 1]} : vector<8x128xf32> to vector<8x30xf32>
    %194 = tpu.concatenate %192, %193 in 1 : vector<8x98xf32>, vector<8x30xf32> -> vector<8x128xf32>
    %195 = arith.mulf %188, %170 : vector<8x128xf32>
    %196 = arith.mulf %185, %194 : vector<8x128xf32>
    %197 = arith.addf %195, %196 : vector<8x128xf32>
    %198 = math.tanh %197 : vector<8x128xf32>
    %199 = arith.mulf %191, %198 : vector<8x128xf32>
    %200 = vector.extract_strided_slice %5 {offsets = [56, 0], sizes = [8, 128], strides = [1, 1]} : vector<64x128xf32> to vector<8x128xf32>
    %c0_49 = arith.constant 0 : index
    %c0_50 = arith.constant 0 : index
    %201 = vector.load %arg2[%c0_49, %c0_50] : memref<128x128xf32, #tpu.memory_space<vmem>>, vector<128x128xf32>
    %cst_51 = arith.constant dense<0.000000e+00> : vector<8x128xf32>
    %202 = tpu.matmul %199, %201, %cst_51 {dimension_numbers = #tpu.dot_dimension_numbers<[1], [0], [0], [1], [0, 0, 1, 1], [], []>} : vector<8x128xf32>, vector<128x128xf32>, vector<8x128xf32> -> vector<8x128xf32>
    %203 = arith.addf %200, %202 : vector<8x128xf32>
    %cst_52 = arith.constant 5.000000e-01 : f32
    %204 = vector.broadcast %cst_52 : f32 to vector<8x128xf32>
    %205 = arith.mulf %204, %203 : vector<8x128xf32>
    %206 = arith.select %8, %205, %203 : vector<8x128xi1>, vector<8x128xf32>
    %207 = math.tanh %206 : vector<8x128xf32>
    %cst_53 = arith.constant 5.000000e-01 : f32
    %208 = vector.broadcast %cst_53 : f32 to vector<8x128xf32>
    %209 = arith.mulf %208, %207 : vector<8x128xf32>
    %cst_54 = arith.constant 5.000000e-01 : f32
    %210 = vector.broadcast %cst_54 : f32 to vector<8x128xf32>
    %211 = arith.addf %209, %210 : vector<8x128xf32>
    %212 = arith.select %8, %211, %207 : vector<8x128xi1>, vector<8x128xf32>
    %213 = vector.extract_strided_slice %212 {offsets = [0, 10], sizes = [8, 118], strides = [1, 1]} : vector<8x128xf32> to vector<8x118xf32>
    %214 = vector.extract_strided_slice %212 {offsets = [0, 0], sizes = [8, 10], strides = [1, 1]} : vector<8x128xf32> to vector<8x10xf32>
    %215 = tpu.concatenate %213, %214 in 1 : vector<8x118xf32>, vector<8x10xf32> -> vector<8x128xf32>
    %216 = vector.extract_strided_slice %212 {offsets = [0, 20], sizes = [8, 108], strides = [1, 1]} : vector<8x128xf32> to vector<8x108xf32>
    %217 = vector.extract_strided_slice %212 {offsets = [0, 0], sizes = [8, 20], strides = [1, 1]} : vector<8x128xf32> to vector<8x20xf32>
    %218 = tpu.concatenate %216, %217 in 1 : vector<8x108xf32>, vector<8x20xf32> -> vector<8x128xf32>
    %219 = vector.extract_strided_slice %212 {offsets = [0, 30], sizes = [8, 98], strides = [1, 1]} : vector<8x128xf32> to vector<8x98xf32>
    %220 = vector.extract_strided_slice %212 {offsets = [0, 0], sizes = [8, 30], strides = [1, 1]} : vector<8x128xf32> to vector<8x30xf32>
    %221 = tpu.concatenate %219, %220 in 1 : vector<8x98xf32>, vector<8x30xf32> -> vector<8x128xf32>
    %222 = arith.mulf %215, %197 : vector<8x128xf32>
    %223 = arith.mulf %212, %221 : vector<8x128xf32>
    %224 = arith.addf %222, %223 : vector<8x128xf32>
    %225 = math.tanh %224 : vector<8x128xf32>
    %226 = arith.mulf %218, %225 : vector<8x128xf32>
    %c0_55 = arith.constant 0 : index
    %c0_56 = arith.constant 0 : index
    %227 = vector.load %arg4[%c0_55, %c0_56] : memref<128x128xf32, #tpu.memory_space<vmem>>, vector<128x128xf32>
    %cst_57 = arith.constant dense<0.000000e+00> : vector<8x128xf32>
    %228 = tpu.matmul %226, %227, %cst_57 {dimension_numbers = #tpu.dot_dimension_numbers<[1], [0], [0], [1], [0, 0, 1, 1], [], []>} : vector<8x128xf32>, vector<128x128xf32>, vector<8x128xf32> -> vector<8x128xf32>
    %c0_58 = arith.constant 0 : index
    %c0_59 = arith.constant 0 : index
    %229 = vector.load %arg5[%c0_58, %c0_59] : memref<1x128xf32, #tpu.memory_space<vmem>>, vector<1x128xf32>
    %230 = vector.broadcast %229 : vector<1x128xf32> to vector<8x128xf32>
    %231 = arith.addf %228, %230 : vector<8x128xf32>
    %c0_60 = arith.constant 0 : index
    %c0_61 = arith.constant 0 : index
    %232 = vector.load %arg6[%c0_60, %c0_61] : memref<8x128xf32, #tpu.memory_space<vmem>>, vector<8x128xf32>
    tpu.vector_store %arg6[%c0_60, %c0_61], %231 {strides = array<i32>} : memref<8x128xf32, #tpu.memory_space<vmem>>, vector<8x128xf32>,
    return
  }
}

</mosaic_0001>

<bundles_post_ra>
// kernel: simple_lstm_forward.1
= control target key start
LH: loop header
LB: loop body
LE: loop exit
PB: predicated region body
PF: predicated region fallthrough
CT: control target
= control target key end

     0   :  { %11 = vsyncpa [#allocation3], 0  ;;  %s2200_s0 = inlined_call_operand.vmem [shape: f32[64,128], index: 0, kind: input, shape index: {}]   ;;  %s2201_s1 = inlined_call_operand.hbm [shape: f32[128,128], index: 1, kind: input, shape index: {}]   ;;  %s2202_s2 = inlined_call_operand.hbm [shape: f32[128,128], index: 2, kind: input, shape index: {}]   ;;  %s2203_s3 = inlined_call_operand.vmem [shape: f32[1,128], index: 3, kind: input, shape index: {}]   ;;  %s2204_s4 = inlined_call_operand.hbm [shape: f32[128,128], index: 4, kind: input, shape index: {}]   ;;  %s2205_s5 = inlined_call_operand.vmem [shape: f32[1,128], index: 5, kind: input, shape index: {}]   ;;  %s2206_s6 = inlined_call_operand.vmem [shape: f32[8,128], index: 6, kind: output, shape index: {}]  }
   0x1   :  { %12 = vsyncpa [#allocation5], 0  ;;  %s1699_s21 = smov [#allocation4]   ;;  %s1700_s23 = smov [#allocation2]  }
   0x2   :  { %s32_s22 = sshll.u32 %s1699_s21, 4  ;;  %s20_s24 = sshll.u32 %s1700_s23, 4  ;;  %s33_s22 = int_to_ptr.vmem [resolvable:$true] %s32_s22  ;;  %s21_s24 = int_to_ptr.vmem [resolvable:$true] %s20_s24 }
   0x3   :  { %s1643_s25 = scalar_lea.vmem %s33_s22, 2048  ;;  %p1648_p1 = scmp.lt.s32.totalorder %s33_s22, %s33_s22 }
   0x4   :  { %p1644_p0 = scmp.ne.s32.totalorder %s33_s22, %s1643_s25  ;;  %p1649_p2 = scmp.lt.s32.totalorder %s1643_s25, %s1643_s25 }
   0x6   :  { %p1650_p3 = por %p1649_p2, %p1648_p1 }
   0x8   :  { %p1651_p4 = pnand %p1650_p3, %p1644_p0 }
   0xa   :  { %1654 = shalt.err (!%p1651_p4)
}
   0xb   :  { %s1701_s26 = smov 128   ;;  %s1702_s27 = smov 8  }
   0xc   :  { %38 = dma.hbm_to_vmem [thread:$0]  %s2202_s2, 2048, %s33_s22, [#allocation5], %s1701_s26, %s1701_s26, %s1702_s27  }
   0xd   :  { %s1663_s30 = scalar_lea.vmem %s21_s24, 2048  ;;  %p1668_p6 = scmp.lt.s32.totalorder %s21_s24, %s21_s24 }
   0xe   :  { %p1664_p5 = scmp.ne.s32.totalorder %s21_s24, %s1663_s30  ;;  %p1669_p7 = scmp.lt.s32.totalorder %s1663_s30, %s1663_s30 }
  0x10   :  { %p1670_p8 = por %p1669_p7, %p1668_p6 }
  0x12   :  { %p1671_p9 = pnand %p1670_p8, %p1664_p5 }
  0x14   :  { %1674 = shalt.err (!%p1671_p9)
}
  0x15   :  { %26 = dma.hbm_to_vmem [thread:$0]  %s2201_s1, 2048, %s21_s24, [#allocation3], %s1701_s26, %s1701_s26, %s1702_s27  }
  0x16   :  { %s1703_s9 = smov [#allocation6]  }
  0x17   :  { %s46_s10 = sshll.u32 %s1703_s9, 4  ;;  %s47_s10 = int_to_ptr.vmem [resolvable:$true] %s46_s10 }
  0x18   :  { %s1683_s11 = scalar_lea.vmem %s47_s10, 2048  ;;  %p1688_p11 = scmp.lt.s32.totalorder %s47_s10, %s47_s10 }
  0x19   :  { %p1684_p10 = scmp.ne.s32.totalorder %s47_s10, %s1683_s11  ;;  %p1689_p12 = scmp.lt.s32.totalorder %s1683_s11, %s1683_s11 }
  0x1b   :  { %p1690_p13 = por %p1689_p12, %p1688_p11 }
  0x1d   :  { %p1691_p0 = pnand %p1690_p13, %p1684_p10 }
  0x1f   :  { %1694 = shalt.err (!%p1691_p0)
}
  0x20   :  { %52 = dma.hbm_to_vmem [thread:$0]  %s2204_s4, 2048, %s47_s10, [#allocation5], %s1701_s26, %s1701_s26, %s1702_s27  }
  0x21   :  { %1695 = dma.done.wait [#allocation3], 2048  }
  0x22   :  { %1696 = vsyncadd [#allocation3], 4294965248 }
  0x23   :  { %1697 = dma.done.wait [#allocation5], 4096  }
  0x24   :  { %1698 = vsyncadd [#allocation5], 4294963200  ;;  %v1704_v0 = vmov 0.0   ;;  %vm1705_vm0 = vmmov 0   ;;  %v87_v1 = vld [vmem:[#allocation2 + $0x78] sm:$0xff]  ;;  %v86_v2 = vld [vmem:[#allocation2 + $0x70] sm:$0xff]  ;;  %v200_v35 = vlaneseq }
  0x25   :  { %1278 = vmatprep.subr.mxu1 %v1704_v0  ;;  %1310 = vmatprep.mubr.msk.f32.mxu1 %vm1705_vm0, %v1704_v0  ;;  %v1756_v3 = vld [vmem:[#allocation4 + $0x78] sm:$0xff]  ;;  %v1759_v4 = vld [vmem:[#allocation4 + $0x70] sm:$0xff]  ;;  %v85_v5 = vld [vmem:[#allocation2 + $0x68] sm:$0xff]  ;;  %s1706_s26 = smov 108   ;;  %s1707_s27 = smov 118  }
  0x26   :  { %1234 = vmatprep.subr.mxu0 %v87_v1  ;;  %1279 = vmatpush3.msra.mxu1 %v1756_v3  ;;  %v1762_v6 = vld [vmem:[#allocation4 + $0x68] sm:$0xff]  ;;  %v84_v7 = vld [vmem:[#allocation2 + $0x60] sm:$0xff]  ;;  %v83_v9 = vld [vmem:[#allocation2 + $0x58] sm:$0xff]  ;;  %v1901_v40 = vand.u32 127, %v200_v35  ;;  %s1708_s30 = smov 98  }
  0x27   :  { %1235 = vmatpush3.msra.mxu0 %v87_v1  ;;  %1280 = vmatprep.subr.mxu1 %v1704_v0  ;;  %v1766_v8 = vld [vmem:[#allocation4 + $0x60] sm:$0xff]  ;;  %v1770_v10 = vld [vmem:[#allocation4 + $0x58] sm:$0xff]  ;;  %v82_v11 = vld [vmem:[#allocation2 + $0x50] sm:$0xff] }
  0x28   :  { %1236 = vmatprep.subr.mxu0 %v86_v2  ;;  %1281 = vmatpush3.msra.mxu1 %v1759_v4  ;;  %v1774_v12 = vld [vmem:[#allocation4 + $0x50] sm:$0xff]  ;;  %v81_v13 = vld [vmem:[#allocation2 + $0x48] sm:$0xff]  ;;  %v80_v15 = vld [vmem:[#allocation2 + $0x40] sm:$0xff]  ;;  %vm202_vm1 = vcmp.lt.s32.totalorder %v1901_v40, 30 }
  0x29   :  { %1237 = vmatpush3.msra.mxu0 %v86_v2  ;;  %1282 = vmatprep.subr.mxu1 %v1704_v0  ;;  %v1778_v14 = vld [vmem:[#allocation4 + $0x48] sm:$0xff]  ;;  %v1782_v16 = vld [vmem:[#allocation4 + $0x40] sm:$0xff]  ;;  %v79_v17 = vld [vmem:[#allocation2 + $0x38] sm:$0xff] }
  0x2a   :  { %1238 = vmatprep.subr.mxu0 %v85_v5  ;;  %1283 = vmatpush3.msra.mxu1 %v1762_v6  ;;  %v1786_v18 = vld [vmem:[#allocation4 + $0x38] sm:$0xff]  ;;  %v78_v19 = vld [vmem:[#allocation2 + $0x30] sm:$0xff]  ;;  %v77_v21 = vld [vmem:[#allocation2 + $0x28] sm:$0xff] }
  0x2b   :  { %1239 = vmatpush3.msra.mxu0 %v85_v5  ;;  %1284 = vmatprep.subr.mxu1 %v1704_v0  ;;  %v1790_v20 = vld [vmem:[#allocation4 + $0x30] sm:$0xff]  ;;  %v1794_v22 = vld [vmem:[#allocation4 + $0x28] sm:$0xff]  ;;  %v76_v23 = vld [vmem:[#allocation2 + $0x20] sm:$0xff] }
  0x2c   :  { %1240 = vmatprep.subr.mxu0 %v84_v7  ;;  %1285 = vmatpush3.msra.mxu1 %v1766_v8  ;;  %v1798_v24 = vld [vmem:[#allocation4 + $0x20] sm:$0xff]  ;;  %v75_v25 = vld [vmem:[#allocation2 + $0x18] sm:$0xff]  ;;  %v74_v27 = vld [vmem:[#allocation2 + $0x10] sm:$0xff] }
  0x2d   :  { %1241 = vmatpush3.msra.mxu0 %v84_v7  ;;  %1286 = vmatprep.subr.mxu1 %v1704_v0  ;;  %v1802_v26 = vld [vmem:[#allocation4 + $0x18] sm:$0xff]  ;;  %v1806_v28 = vld [vmem:[#allocation4 + $0x10] sm:$0xff]  ;;  %v73_v29 = vld [vmem:[#allocation2 + $0x8] sm:$0xff] }
  0x2e   :  { %1242 = vmatprep.subr.mxu0 %v83_v9  ;;  %1287 = vmatpush3.msra.mxu1 %v1770_v10  ;;  %v64_v30 = vld [vmem:[%s2200_s0] sm:$0xff]  ;;  %v1814_v31 = vld [vmem:[#allocation4 + $0x8] sm:$0xff]  ;;  %v66_v48 = vld [vmem:[%s2200_s0 + $0x10] sm:$0xff] }
  0x2f   :  { %1243 = vmatpush3.msra.mxu0 %v83_v9  ;;  %1288 = vmatprep.subr.mxu1 %v1704_v0  ;;  %v72_v32 = vld [vmem:[#allocation2] sm:$0xff]  ;;  %v65_v34 = vld [vmem:[%s2200_s0 + $0x8] sm:$0xff]  ;;  %v67_v49 = vld [vmem:[%s2200_s0 + $0x18] sm:$0xff] }
  0x30   :  { %1244 = vmatprep.subr.mxu0 %v82_v11  ;;  %1289 = vmatpush3.msra.mxu1 %v1774_v12  ;;  %v1817_v33 = vld [vmem:[#allocation4] sm:$0xff]  ;;  %v69_v52 = vld [vmem:[%s2200_s0 + $0x28] sm:$0xff]  ;;  %v70_v54 = vld [vmem:[%s2200_s0 + $0x30] sm:$0xff] }
  0x31   :  { %1245 = vmatpush3.msra.mxu0 %v82_v11  ;;  %1290 = vmatprep.subr.mxu1 %v1704_v0  ;;  %v1899_v38 = vld [vmem:[%s2203_s3] ss:$0 sm:$0xff]  ;;  %v71_v55 = vld [vmem:[%s2200_s0 + $0x38] sm:$0xff] }
  0x32   :  { %1246 = vmatprep.subr.mxu0 %v81_v13  ;;  %1291 = vmatpush3.msra.mxu1 %v1778_v14  ;;  %v68_v50 = vld [vmem:[%s2200_s0 + $0x20] sm:$0xff] }
  0x33   :  { %1247 = vmatpush3.msra.mxu0 %v81_v13  ;;  %1292 = vmatprep.subr.mxu1 %v1704_v0  ;;  %v955_v40 = vld [vmem:[#allocation6] sm:$0xff] }
  0x34   :  { %1248 = vmatprep.subr.mxu0 %v80_v15  ;;  %1293 = vmatpush3.msra.mxu1 %v1782_v16 }
  0x35   :  { %1249 = vmatpush3.msra.mxu0 %v80_v15  ;;  %1294 = vmatprep.subr.mxu1 %v1704_v0 }
  0x36   :  { %1250 = vmatprep.subr.mxu0 %v79_v17  ;;  %1295 = vmatpush3.msra.mxu1 %v1786_v18 }
  0x37   :  { %1251 = vmatpush3.msra.mxu0 %v79_v17  ;;  %1296 = vmatprep.subr.mxu1 %v1704_v0 }
  0x38   :  { %1252 = vmatprep.subr.mxu0 %v78_v19  ;;  %1297 = vmatpush3.msra.mxu1 %v1790_v20 }
  0x39   :  { %1253 = vmatpush3.msra.mxu0 %v78_v19  ;;  %1298 = vmatprep.subr.mxu1 %v1704_v0 }
  0x3a   :  { %1254 = vmatprep.subr.mxu0 %v77_v21  ;;  %1299 = vmatpush3.msra.mxu1 %v1794_v22 }
  0x3b   :  { %1255 = vmatpush3.msra.mxu0 %v77_v21  ;;  %1300 = vmatprep.subr.mxu1 %v1704_v0 }
  0x3c   :  { %1256 = vmatprep.subr.mxu0 %v76_v23  ;;  %1301 = vmatpush3.msra.mxu1 %v1798_v24 }
  0x3d   :  { %1257 = vmatpush3.msra.mxu0 %v76_v23  ;;  %1302 = vmatprep.subr.mxu1 %v1704_v0 }
  0x3e   :  { %1258 = vmatprep.subr.mxu0 %v75_v25  ;;  %1303 = vmatpush3.msra.mxu1 %v1802_v26 }
  0x3f   :  { %1259 = vmatpush3.msra.mxu0 %v75_v25  ;;  %1304 = vmatprep.subr.mxu1 %v1704_v0 }
  0x40   :  { %1260 = vmatprep.subr.mxu0 %v74_v27  ;;  %1305 = vmatpush3.msra.mxu1 %v1806_v28 }
  0x41   :  { %1261 = vmatpush3.msra.mxu0 %v74_v27  ;;  %1306 = vmatprep.subr.mxu1 %v1704_v0 }
  0x42   :  { %1262 = vmatprep.subr.mxu0 %v73_v29  ;;  %1266 = vmatprep.mubr.f32.mxu0 %v64_v30 }
  0x43   :  { %1263 = vmatpush3.msra.mxu0 %v73_v29  ;;  %1307 = vmatpush3.msra.mxu1 %v1814_v31 }
  0x44   :  { %1264 = vmatprep.subr.mxu0 %v72_v32  ;;  %1308 = vmatprep.subr.mxu1 %v1704_v0 }
  0x45   :  { %1265 = vmatpush3.msra.mxu0 %v72_v32  ;;  %1309 = vmatpush3.msra.mxu1 %v1817_v33 }
  0x46   :  { %1267 = vmatmul.mubr.f32.vlgmr.msra.gmra.mxu0 %v65_v34  ;;  %1311 = vmatmul.mubr.f32.vlgmr.msra.gmra.mxu1 %v1704_v0 }
  0x47   :  { %1313 = vmatprep.subr.mxu0 %v1704_v0  ;;  %1348 = vmatprep.subr.mxu1 %v1704_v0 }
  0x48   :  { %1314 = vmatpush3.msra.mxu0 %v1756_v3  ;;  %1349 = vmatpush3.msra.mxu1 %v1756_v3 }
  0x49   :  { %1315 = vmatprep.subr.mxu0 %v1704_v0  ;;  %1350 = vmatprep.subr.mxu1 %v1704_v0 }
  0x4a   :  { %1316 = vmatpush3.msra.mxu0 %v1759_v4  ;;  %1351 = vmatpush3.msra.mxu1 %v1759_v4 }
  0x4b   :  { %1317 = vmatprep.subr.mxu0 %v1704_v0  ;;  %1352 = vmatprep.subr.mxu1 %v1704_v0 }
  0x4c   :  { %1318 = vmatpush3.msra.mxu0 %v1762_v6  ;;  %1353 = vmatpush3.msra.mxu1 %v1762_v6 }
  0x4d   :  { %1319 = vmatprep.subr.mxu0 %v1704_v0  ;;  %1354 = vmatprep.subr.mxu1 %v1704_v0 }
  0x4e   :  { %1320 = vmatpush3.msra.mxu0 %v1766_v8  ;;  %1355 = vmatpush3.msra.mxu1 %v1766_v8 }
  0x4f   :  { %1321 = vmatprep.subr.mxu0 %v1704_v0  ;;  %1356 = vmatprep.subr.mxu1 %v1704_v0 }
  0x50   :  { %1322 = vmatpush3.msra.mxu0 %v1770_v10  ;;  %1357 = vmatpush3.msra.mxu1 %v1770_v10 }
  0x51   :  { %1323 = vmatprep.subr.mxu0 %v1704_v0  ;;  %1358 = vmatprep.subr.mxu1 %v1704_v0 }
  0x52   :  { %1324 = vmatpush3.msra.mxu0 %v1774_v12  ;;  %1359 = vmatpush3.msra.mxu1 %v1774_v12 }
  0x53   :  { %1325 = vmatprep.subr.mxu0 %v1704_v0  ;;  %1360 = vmatprep.subr.mxu1 %v1704_v0 }
  0x54   :  { %1326 = vmatpush3.msra.mxu0 %v1778_v14  ;;  %1361 = vmatpush3.msra.mxu1 %v1778_v14 }
  0x55   :  { %1327 = vmatprep.subr.mxu0 %v1704_v0  ;;  %1362 = vmatprep.subr.mxu1 %v1704_v0 }
  0x56   :  { %1328 = vmatpush3.msra.mxu0 %v1782_v16  ;;  %1363 = vmatpush3.msra.mxu1 %v1782_v16 }
  0x57   :  { %1329 = vmatprep.subr.mxu0 %v1704_v0  ;;  %1364 = vmatprep.subr.mxu1 %v1704_v0 }
  0x58   :  { %1330 = vmatpush3.msra.mxu0 %v1786_v18  ;;  %1365 = vmatpush3.msra.mxu1 %v1786_v18 }
  0x59   :  { %1331 = vmatprep.subr.mxu0 %v1704_v0  ;;  %1366 = vmatprep.subr.mxu1 %v1704_v0 }
  0x5a   :  { %1332 = vmatpush3.msra.mxu0 %v1790_v20  ;;  %1367 = vmatpush3.msra.mxu1 %v1790_v20 }
  0x5b   :  { %1333 = vmatprep.subr.mxu0 %v1704_v0  ;;  %1368 = vmatprep.subr.mxu1 %v1704_v0 }
  0x5c   :  { %1334 = vmatpush3.msra.mxu0 %v1794_v22  ;;  %1369 = vmatpush3.msra.mxu1 %v1794_v22 }
  0x5d   :  { %1335 = vmatprep.subr.mxu0 %v1704_v0  ;;  %1370 = vmatprep.subr.mxu1 %v1704_v0 }
  0x5e   :  { %1336 = vmatpush3.msra.mxu0 %v1798_v24  ;;  %1371 = vmatpush3.msra.mxu1 %v1798_v24 }
  0x5f   :  { %1337 = vmatprep.subr.mxu0 %v1704_v0  ;;  %1372 = vmatprep.subr.mxu1 %v1704_v0 }
  0x60   :  { %1338 = vmatpush3.msra.mxu0 %v1802_v26  ;;  %1373 = vmatpush3.msra.mxu1 %v1802_v26 }
  0x61   :  { %1339 = vmatprep.subr.mxu0 %v1704_v0  ;;  %1374 = vmatprep.subr.mxu1 %v1704_v0 }
  0x62   :  { %1340 = vmatpush3.msra.mxu0 %v1806_v28  ;;  %1375 = vmatpush3.msra.mxu1 %v1806_v28 }
  0x63   :  { %1341 = vmatprep.subr.mxu0 %v1704_v0  ;;  %1376 = vmatprep.subr.mxu1 %v1704_v0 }
  0x64   :  { %1342 = vmatpush3.msra.mxu0 %v1814_v31  ;;  %1377 = vmatpush3.msra.mxu1 %v1814_v31 }
  0x65   :  { %1343 = vmatprep.subr.mxu0 %v1704_v0  ;;  %1378 = vmatprep.subr.mxu1 %v1704_v0 }
  0x66   :  { %1344 = vmatpush3.msra.mxu0 %v1817_v33  ;;  %1379 = vmatpush3.msra.mxu1 %v1817_v33 }
  0x67   :  { %1380 = vmatprep.mubr.msk.f32.mxu1 %vm1705_vm0, %v1704_v0  ;;  %1383 = vmatprep.subr.mxu0 %v1704_v0 }
  0x68   :  { %1418 = vmatprep.subr.mxu1 %v1704_v0  ;;  %1269 = vmatprep.mubr.f32.mxu0 %v66_v48 }
  0x69   :  { %1270 = vmatmul.mubr.f32.gmra.mxu0 %v67_v49 }
  0x6a   :  { %1272 = vmatprep.mubr.f32.mxu0 %v68_v50 }
  0x6d   :  { %1273 = vmatmul.mubr.f32.gmra.mxu0 %v69_v52 }
  0x6e   :  { %1275 = vmatprep.mubr.f32.mxu0 %v70_v54 }
  0x71   :  { %1276 = vmatmul.mubr.f32.gmra.mxu0 %v71_v55 }
  0x72   :  { %1345 = vmatprep.mubr.msk.f32.mxu0 %vm1705_vm0, %v1704_v0 }
 0x106   :  { %v1894_v36 = vpop.f32.mrf.mxu0  ;;  %v285_v37 = vpop.f32.mrf.mxu1 }
 0x107   :  { %v167_v13 = vadd.f32 %v1894_v36, %v1899_v38 }
 0x108   :  { %v161_v39 = vpop.f32.mrf.mxu0  ;;  %v1312_v41 = vpop.f32.mrf.mxu1 }
 0x109   :  { %v162_v42 = vadd.f32 %v1899_v38, %v161_v39 }
 0x10b   :  { %v289_v43 = vadd.f32 %v285_v37, %v162_v42 }
 0x10d   :  { %v290_v44 = vmul.f32 0.5, %v289_v43 }
 0x10f   :  { %v291_v45 = vsel %vm202_vm1, %v290_v44, %v289_v43 }
 0x110   :  { %1603 = vtanh.f32 %v291_v45 }
 0x11d   :  { %v1604_v46 = vpop.eup %1603 }
 0x11e   :  { %v293_v47 = vmul.f32 0.5, %v1604_v46 }
 0x120   :  { %v294_v51 = vadd.f32 0.5, %v293_v47 }
 0x122   :  { %v295_v53 = vsel %vm202_vm1, %v294_v51, %v1604_v46 }
 0x123   :  { %300 = vrot.lane.b32.xlu1 %v295_v53, %s1706_s26  ;;  %297 = vrot.lane.b32.xlu0 %v295_v53, %s1707_s27 }
 0x127   :  { %303 = vrot.lane.b32.xlu0 %v295_v53, %s1708_s30 }
 0x129   :  { %v1966_v1 = vpop.f32.mrf.mxu0 }
 0x12b   :  { %v171_v2 = vpop.f32.mrf.mxu0 }
 0x12c   :  { %v172_v43 = vadd.f32 %v1899_v38, %v171_v2 }
 0x12d   :  { %v1968_v5 = vpop.f32.mrf.mxu0 }
 0x12f   :  { %v1970_v7 = vpop.f32.mrf.mxu0 }
 0x131   :  { %v1972_v9 = vpop.f32.mrf.mxu0 }
 0x133   :  { %v1974_v11 = vpop.f32.mrf.mxu0 }
 0x195   :  { %v298_v56 = vpop.permute.xlu0 %297  ;;  %v301_v62 = vpop.permute.xlu1 %300 }
 0x196   :  { %v306_v58 = vmul.f32 0.0, %v298_v56 }
 0x199   :  { %v304_v57 = vpop.permute.xlu0 %303 }
 0x19a   :  { %v307_v59 = vmul.f32 %v304_v57, %v295_v53 }
 0x19c   :  { %v308_v60 = vadd.f32 %v307_v59, %v306_v58 }
 0x19e   :  { %1605 = vtanh.f32 %v308_v60 }
 0x1ab   :  { %v1606_v61 = vpop.eup %1605 }
 0x1ac   :  { %v310_v63 = vmul.f32 %v1606_v61, %v301_v62  ;;  %v177_v61 = vadd.f32 %v1966_v1, %v1899_v38 }
 0x1ae   :  { %1346 = vmatmul.mubr.f32.vlgmr.msra.gmra.mxu0 %v310_v63 }
 0x1af   :  { %1384 = vmatpush3.msra.mxu0 %v1756_v3  ;;  %1415 = vmatprep.mubr.msk.f32.mxu0 %vm1705_vm0, %v1704_v0 }
 0x1b0   :  { %1385 = vmatprep.subr.mxu0 %v1704_v0 }
 0x1b1   :  { %1386 = vmatpush3.msra.mxu0 %v1759_v4 }
 0x1b2   :  { %1387 = vmatprep.subr.mxu0 %v1704_v0 }
 0x1b3   :  { %1388 = vmatpush3.msra.mxu0 %v1762_v6 }
 0x1b4   :  { %1389 = vmatprep.subr.mxu0 %v1704_v0 }
 0x1b5   :  { %1390 = vmatpush3.msra.mxu0 %v1766_v8 }
 0x1b6   :  { %1391 = vmatprep.subr.mxu0 %v1704_v0 }
 0x1b7   :  { %1392 = vmatpush3.msra.mxu0 %v1770_v10 }
 0x1b8   :  { %1393 = vmatprep.subr.mxu0 %v1704_v0 }
 0x1b9   :  { %1394 = vmatpush3.msra.mxu0 %v1774_v12 }
 0x1ba   :  { %1395 = vmatprep.subr.mxu0 %v1704_v0 }
 0x1bb   :  { %1396 = vmatpush3.msra.mxu0 %v1778_v14 }
 0x1bc   :  { %1397 = vmatprep.subr.mxu0 %v1704_v0 }
 0x1bd   :  { %1398 = vmatpush3.msra.mxu0 %v1782_v16 }
 0x1be   :  { %1399 = vmatprep.subr.mxu0 %v1704_v0 }
 0x1bf   :  { %1400 = vmatpush3.msra.mxu0 %v1786_v18 }
 0x1c0   :  { %1401 = vmatprep.subr.mxu0 %v1704_v0 }
 0x1c1   :  { %1402 = vmatpush3.msra.mxu0 %v1790_v20 }
 0x1c2   :  { %1403 = vmatprep.subr.mxu0 %v1704_v0 }
 0x1c3   :  { %1404 = vmatpush3.msra.mxu0 %v1794_v22 }
 0x1c4   :  { %1405 = vmatprep.subr.mxu0 %v1704_v0 }
 0x1c5   :  { %1406 = vmatpush3.msra.mxu0 %v1798_v24 }
 0x1c6   :  { %1407 = vmatprep.subr.mxu0 %v1704_v0 }
 0x1c7   :  { %1408 = vmatpush3.msra.mxu0 %v1802_v26 }
 0x1c8   :  { %1409 = vmatprep.subr.mxu0 %v1704_v0 }
 0x1c9   :  { %1410 = vmatpush3.msra.mxu0 %v1806_v28 }
 0x1ca   :  { %1411 = vmatprep.subr.mxu0 %v1704_v0 }
 0x1cb   :  { %1412 = vmatpush3.msra.mxu0 %v1814_v31 }
 0x1cc   :  { %1413 = vmatprep.subr.mxu0 %v1704_v0 }
 0x1cd   :  { %1414 = vmatpush3.msra.mxu0 %v1817_v33 }
 0x1ce   :  { %1453 = vmatprep.subr.mxu0 %v1704_v0 }
 0x26e   :  { %v377_v15 = vpop.f32.mrf.mxu0 }
 0x26f   :  { %v381_v17 = vadd.f32 %v377_v15, %v167_v13 }
 0x270   :  { %v1347_v19 = vpop.f32.mrf.mxu0 }
 0x271   :  { %v382_v21 = vmul.f32 0.5, %v381_v17 }
 0x273   :  { %v383_v23 = vsel %vm202_vm1, %v382_v21, %v381_v17 }
 0x274   :  { %1607 = vtanh.f32 %v383_v23 }
 0x281   :  { %v1608_v25 = vpop.eup %1607 }
 0x282   :  { %v385_v27 = vmul.f32 0.5, %v1608_v25 }
 0x284   :  { %v386_v29 = vadd.f32 0.5, %v385_v27 }
 0x286   :  { %v387_v30 = vsel %vm202_vm1, %v386_v29, %v1608_v25 }
 0x287   :  { %395 = vrot.lane.b32.xlu0 %v387_v30, %s1708_s30  ;;  %389 = vrot.lane.b32.xlu1 %v387_v30, %s1707_s27 }
 0x28b   :  { %392 = vrot.lane.b32.xlu1 %v387_v30, %s1706_s26 }
 0x2f9   :  { %v396_v32 = vpop.permute.xlu0 %395  ;;  %v390_v34 = vpop.permute.xlu1 %389 }
 0x2fa   :  { %v399_v35 = vmul.f32 %v396_v32, %v387_v30  ;;  %v398_v36 = vmul.f32 %v390_v34, %v308_v60 }
 0x2fc   :  { %v400_v37 = vadd.f32 %v399_v35, %v398_v36  ;;  %v182_v36 = vadd.f32 %v1899_v38, %v1970_v7 }
 0x2fd   :  { %v393_v41 = vpop.permute.xlu1 %392 }
 0x2fe   :  { %1609 = vtanh.f32 %v400_v37 }
 0x30b   :  { %v1610_v39 = vpop.eup %1609 }
 0x30c   :  { %v402_v42 = vmul.f32 %v1610_v39, %v393_v41 }
 0x30e   :  { %1381 = vmatmul.mubr.f32.vlgmr.msra.gmra.mxu1 %v402_v42 }
 0x30f   :  { %1419 = vmatpush3.msra.mxu1 %v1756_v3  ;;  %1450 = vmatprep.mubr.msk.f32.mxu1 %vm1705_vm0, %v1704_v0 }
 0x310   :  { %1420 = vmatprep.subr.mxu1 %v1704_v0 }
 0x311   :  { %1421 = vmatpush3.msra.mxu1 %v1759_v4 }
 0x312   :  { %1422 = vmatprep.subr.mxu1 %v1704_v0 }
 0x313   :  { %1423 = vmatpush3.msra.mxu1 %v1762_v6 }
 0x314   :  { %1424 = vmatprep.subr.mxu1 %v1704_v0 }
 0x315   :  { %1425 = vmatpush3.msra.mxu1 %v1766_v8 }
 0x316   :  { %1426 = vmatprep.subr.mxu1 %v1704_v0 }
 0x317   :  { %1427 = vmatpush3.msra.mxu1 %v1770_v10 }
 0x318   :  { %1428 = vmatprep.subr.mxu1 %v1704_v0 }
 0x319   :  { %1429 = vmatpush3.msra.mxu1 %v1774_v12 }
 0x31a   :  { %1430 = vmatprep.subr.mxu1 %v1704_v0 }
 0x31b   :  { %1431 = vmatpush3.msra.mxu1 %v1778_v14 }
 0x31c   :  { %1432 = vmatprep.subr.mxu1 %v1704_v0 }
 0x31d   :  { %1433 = vmatpush3.msra.mxu1 %v1782_v16 }
 0x31e   :  { %1434 = vmatprep.subr.mxu1 %v1704_v0 }
 0x31f   :  { %1435 = vmatpush3.msra.mxu1 %v1786_v18 }
 0x320   :  { %1436 = vmatprep.subr.mxu1 %v1704_v0 }
 0x321   :  { %1437 = vmatpush3.msra.mxu1 %v1790_v20 }
 0x322   :  { %1438 = vmatprep.subr.mxu1 %v1704_v0 }
 0x323   :  { %1439 = vmatpush3.msra.mxu1 %v1794_v22 }
 0x324   :  { %1440 = vmatprep.subr.mxu1 %v1704_v0 }
 0x325   :  { %1441 = vmatpush3.msra.mxu1 %v1798_v24 }
 0x326   :  { %1442 = vmatprep.subr.mxu1 %v1704_v0 }
 0x327   :  { %1443 = vmatpush3.msra.mxu1 %v1802_v26 }
 0x328   :  { %1444 = vmatprep.subr.mxu1 %v1704_v0 }
 0x329   :  { %1445 = vmatpush3.msra.mxu1 %v1806_v28 }
 0x32a   :  { %1446 = vmatprep.subr.mxu1 %v1704_v0 }
 0x32b   :  { %1447 = vmatpush3.msra.mxu1 %v1814_v31 }
 0x32c   :  { %1448 = vmatprep.subr.mxu1 %v1704_v0 }
 0x32d   :  { %1449 = vmatpush3.msra.mxu1 %v1817_v33 }
 0x32e   :  { %1488 = vmatprep.subr.mxu1 %v1704_v0 }
 0x3ce   :  { %v469_v44 = vpop.f32.mrf.mxu1 }
 0x3cf   :  { %v473_v45 = vadd.f32 %v469_v44, %v172_v43 }
 0x3d0   :  { %v1382_v46 = vpop.f32.mrf.mxu1 }
 0x3d1   :  { %v474_v47 = vmul.f32 0.5, %v473_v45 }
 0x3d3   :  { %v475_v48 = vsel %vm202_vm1, %v474_v47, %v473_v45 }
 0x3d4   :  { %1611 = vtanh.f32 %v475_v48 }
 0x3e1   :  { %v1612_v49 = vpop.eup %1611 }
 0x3e2   :  { %v477_v50 = vmul.f32 0.5, %v1612_v49 }
 0x3e4   :  { %v478_v51 = vadd.f32 0.5, %v477_v50 }
 0x3e6   :  { %v479_v52 = vsel %vm202_vm1, %v478_v51, %v1612_v49 }
 0x3e7   :  { %487 = vrot.lane.b32.xlu1 %v479_v52, %s1708_s30  ;;  %481 = vrot.lane.b32.xlu0 %v479_v52, %s1707_s27 }
 0x3eb   :  { %484 = vrot.lane.b32.xlu0 %v479_v52, %s1706_s26 }
 0x459   :  { %v488_v53 = vpop.permute.xlu1 %487  ;;  %v482_v54 = vpop.permute.xlu0 %481 }
 0x45a   :  { %v491_v55 = vmul.f32 %v488_v53, %v479_v52  ;;  %v490_v56 = vmul.f32 %v482_v54, %v400_v37 }
 0x45c   :  { %v492_v57 = vadd.f32 %v491_v55, %v490_v56  ;;  %v192_v56 = vadd.f32 %v1899_v38, %v1974_v11 }
 0x45d   :  { %v485_v59 = vpop.permute.xlu0 %484 }
 0x45e   :  { %1613 = vtanh.f32 %v492_v57 }
 0x46b   :  { %v1614_v58 = vpop.eup %1613 }
 0x46c   :  { %v494_v60 = vmul.f32 %v1614_v58, %v485_v59 }
 0x46e   :  { %1416 = vmatmul.mubr.f32.vlgmr.msra.gmra.mxu0 %v494_v60 }
 0x46f   :  { %1454 = vmatpush3.msra.mxu0 %v1756_v3  ;;  %1485 = vmatprep.mubr.msk.f32.mxu0 %vm1705_vm0, %v1704_v0 }
 0x470   :  { %1455 = vmatprep.subr.mxu0 %v1704_v0 }
 0x471   :  { %1456 = vmatpush3.msra.mxu0 %v1759_v4 }
 0x472   :  { %1457 = vmatprep.subr.mxu0 %v1704_v0 }
 0x473   :  { %1458 = vmatpush3.msra.mxu0 %v1762_v6 }
 0x474   :  { %1459 = vmatprep.subr.mxu0 %v1704_v0 }
 0x475   :  { %1460 = vmatpush3.msra.mxu0 %v1766_v8 }
 0x476   :  { %1461 = vmatprep.subr.mxu0 %v1704_v0 }
 0x477   :  { %1462 = vmatpush3.msra.mxu0 %v1770_v10 }
 0x478   :  { %1463 = vmatprep.subr.mxu0 %v1704_v0 }
 0x479   :  { %1464 = vmatpush3.msra.mxu0 %v1774_v12 }
 0x47a   :  { %1465 = vmatprep.subr.mxu0 %v1704_v0 }
 0x47b   :  { %1466 = vmatpush3.msra.mxu0 %v1778_v14 }
 0x47c   :  { %1467 = vmatprep.subr.mxu0 %v1704_v0 }
 0x47d   :  { %1468 = vmatpush3.msra.mxu0 %v1782_v16 }
 0x47e   :  { %1469 = vmatprep.subr.mxu0 %v1704_v0 }
 0x47f   :  { %1470 = vmatpush3.msra.mxu0 %v1786_v18 }
 0x480   :  { %1471 = vmatprep.subr.mxu0 %v1704_v0 }
 0x481   :  { %1472 = vmatpush3.msra.mxu0 %v1790_v20 }
 0x482   :  { %1473 = vmatprep.subr.mxu0 %v1704_v0 }
 0x483   :  { %1474 = vmatpush3.msra.mxu0 %v1794_v22 }
 0x484   :  { %1475 = vmatprep.subr.mxu0 %v1704_v0 }
 0x485   :  { %1476 = vmatpush3.msra.mxu0 %v1798_v24 }
 0x486   :  { %1477 = vmatprep.subr.mxu0 %v1704_v0 }
 0x487   :  { %1478 = vmatpush3.msra.mxu0 %v1802_v26 }
 0x488   :  { %1479 = vmatprep.subr.mxu0 %v1704_v0 }
 0x489   :  { %1480 = vmatpush3.msra.mxu0 %v1806_v28 }
 0x48a   :  { %1481 = vmatprep.subr.mxu0 %v1704_v0 }
 0x48b   :  { %1482 = vmatpush3.msra.mxu0 %v1814_v31 }
 0x48c   :  { %1483 = vmatprep.subr.mxu0 %v1704_v0 }
 0x48d   :  { %1484 = vmatpush3.msra.mxu0 %v1817_v33 }
 0x48e   :  { %1523 = vmatprep.subr.mxu0 %v1704_v0 }
 0x52e   :  { %v561_v62 = vpop.f32.mrf.mxu0 }
 0x52f   :  { %v565_v63 = vadd.f32 %v561_v62, %v177_v61 }
 0x530   :  { %v1417_v2 = vpop.f32.mrf.mxu0 }
 0x531   :  { %v566_v13 = vmul.f32 0.5, %v565_v63 }
 0x533   :  { %v567_v15 = vsel %vm202_vm1, %v566_v13, %v565_v63 }
 0x534   :  { %1615 = vtanh.f32 %v567_v15 }
 0x541   :  { %v1616_v17 = vpop.eup %1615 }
 0x542   :  { %v569_v19 = vmul.f32 0.5, %v1616_v17 }
 0x544   :  { %v570_v21 = vadd.f32 0.5, %v569_v19 }
 0x546   :  { %v571_v23 = vsel %vm202_vm1, %v570_v21, %v1616_v17 }
 0x547   :  { %579 = vrot.lane.b32.xlu0 %v571_v23, %s1708_s30  ;;  %573 = vrot.lane.b32.xlu1 %v571_v23, %s1707_s27 }
 0x54b   :  { %576 = vrot.lane.b32.xlu1 %v571_v23, %s1706_s26 }
 0x5b9   :  { %v580_v1 = vpop.permute.xlu0 %579  ;;  %v574_v25 = vpop.permute.xlu1 %573 }
 0x5ba   :  { %v583_v27 = vmul.f32 %v580_v1, %v571_v23  ;;  %v582_v29 = vmul.f32 %v574_v25, %v492_v57 }
 0x5bc   :  { %v584_v30 = vadd.f32 %v583_v27, %v582_v29  ;;  %v970_v27 = vld [vmem:[#allocation6 + $0x78] sm:$0xff]  ;;  %v969_v29 = vld [vmem:[#allocation6 + $0x70] sm:$0xff] }
 0x5bd   :  { %v577_v34 = vpop.permute.xlu1 %576 }
 0x5be   :  { %1617 = vtanh.f32 %v584_v30 }
 0x5cb   :  { %v1618_v32 = vpop.eup %1617 }
 0x5cc   :  { %v586_v35 = vmul.f32 %v1618_v32, %v577_v34  ;;  %v967_v32 = vld [vmem:[#allocation6 + $0x60] sm:$0xff]  ;;  %v966_v34 = vld [vmem:[#allocation6 + $0x58] sm:$0xff] }
 0x5ce   :  { %1451 = vmatmul.mubr.f32.vlgmr.msra.gmra.mxu1 %v586_v35  ;;  %v965_v35 = vld [vmem:[#allocation6 + $0x50] sm:$0xff] }
 0x5cf   :  { %1489 = vmatpush3.msra.mxu1 %v1756_v3  ;;  %1520 = vmatprep.mubr.msk.f32.mxu1 %vm1705_vm0, %v1704_v0 }
 0x5d0   :  { %1490 = vmatprep.subr.mxu1 %v1704_v0 }
 0x5d1   :  { %1491 = vmatpush3.msra.mxu1 %v1759_v4 }
 0x5d2   :  { %1492 = vmatprep.subr.mxu1 %v1704_v0 }
 0x5d3   :  { %1493 = vmatpush3.msra.mxu1 %v1762_v6 }
 0x5d4   :  { %1494 = vmatprep.subr.mxu1 %v1704_v0 }
 0x5d5   :  { %1495 = vmatpush3.msra.mxu1 %v1766_v8 }
 0x5d6   :  { %1496 = vmatprep.subr.mxu1 %v1704_v0 }
 0x5d7   :  { %1497 = vmatpush3.msra.mxu1 %v1770_v10 }
 0x5d8   :  { %1498 = vmatprep.subr.mxu1 %v1704_v0 }
 0x5d9   :  { %1499 = vmatpush3.msra.mxu1 %v1774_v12 }
 0x5da   :  { %1500 = vmatprep.subr.mxu1 %v1704_v0 }
 0x5db   :  { %1501 = vmatpush3.msra.mxu1 %v1778_v14 }
 0x5dc   :  { %1502 = vmatprep.subr.mxu1 %v1704_v0 }
 0x5dd   :  { %1503 = vmatpush3.msra.mxu1 %v1782_v16 }
 0x5de   :  { %1504 = vmatprep.subr.mxu1 %v1704_v0 }
 0x5df   :  { %1505 = vmatpush3.msra.mxu1 %v1786_v18 }
 0x5e0   :  { %1506 = vmatprep.subr.mxu1 %v1704_v0 }
 0x5e1   :  { %1507 = vmatpush3.msra.mxu1 %v1790_v20 }
 0x5e2   :  { %1508 = vmatprep.subr.mxu1 %v1704_v0 }
 0x5e3   :  { %1509 = vmatpush3.msra.mxu1 %v1794_v22 }
 0x5e4   :  { %1510 = vmatprep.subr.mxu1 %v1704_v0 }
 0x5e5   :  { %1511 = vmatpush3.msra.mxu1 %v1798_v24 }
 0x5e6   :  { %1512 = vmatprep.subr.mxu1 %v1704_v0 }
 0x5e7   :  { %1513 = vmatpush3.msra.mxu1 %v1802_v26 }
 0x5e8   :  { %1514 = vmatprep.subr.mxu1 %v1704_v0 }
 0x5e9   :  { %1515 = vmatpush3.msra.mxu1 %v1806_v28 }
 0x5ea   :  { %1516 = vmatprep.subr.mxu1 %v1704_v0 }
 0x5eb   :  { %1517 = vmatpush3.msra.mxu1 %v1814_v31 }
 0x5ec   :  { %1518 = vmatprep.subr.mxu1 %v1704_v0 }
 0x5ed   :  { %1519 = vmatpush3.msra.mxu1 %v1817_v33 }
 0x5ee   :  { %1558 = vmatprep.subr.mxu1 %v1704_v0 }
 0x68e   :  { %v653_v37 = vpop.f32.mrf.mxu1 }
 0x68f   :  { %v657_v39 = vadd.f32 %v653_v37, %v182_v36  ;;  %v197_v36 = vadd.f32 %v1972_v9, %v1899_v38 }
 0x690   :  { %v1452_v41 = vpop.f32.mrf.mxu1 }
 0x691   :  { %v658_v42 = vmul.f32 0.5, %v657_v39 }
 0x693   :  { %v659_v43 = vsel %vm202_vm1, %v658_v42, %v657_v39 }
 0x694   :  { %1619 = vtanh.f32 %v659_v43 }
 0x6a1   :  { %v1620_v44 = vpop.eup %1619 }
 0x6a2   :  { %v661_v45 = vmul.f32 0.5, %v1620_v44 }
 0x6a4   :  { %v662_v46 = vadd.f32 0.5, %v661_v45  ;;  %v963_v45 = vld [vmem:[#allocation6 + $0x40] sm:$0xff] }
 0x6a6   :  { %v663_v47 = vsel %vm202_vm1, %v662_v46, %v1620_v44  ;;  %v964_v44 = vld [vmem:[#allocation6 + $0x48] sm:$0xff]  ;;  %v962_v46 = vld [vmem:[#allocation6 + $0x38] sm:$0xff] }
 0x6a7   :  { %671 = vrot.lane.b32.xlu1 %v663_v47, %s1708_s30  ;;  %665 = vrot.lane.b32.xlu0 %v663_v47, %s1707_s27 }
 0x6ab   :  { %668 = vrot.lane.b32.xlu0 %v663_v47, %s1706_s26 }
 0x719   :  { %v672_v7 = vpop.permute.xlu1 %671  ;;  %v666_v48 = vpop.permute.xlu0 %665 }
 0x71a   :  { %v675_v49 = vmul.f32 %v672_v7, %v663_v47  ;;  %v674_v50 = vmul.f32 %v666_v48, %v584_v30  ;;  %v968_v30 = vld [vmem:[#allocation6 + $0x68] sm:$0xff] }
 0x71b   :  { %v960_v7 = vld [vmem:[#allocation6 + $0x28] sm:$0xff] }
 0x71c   :  { %v676_v51 = vadd.f32 %v675_v49, %v674_v50  ;;  %v959_v49 = vld [vmem:[#allocation6 + $0x20] sm:$0xff] }
 0x71d   :  { %v669_v53 = vpop.permute.xlu0 %668 }
 0x71e   :  { %1621 = vtanh.f32 %v676_v51 }
 0x72b   :  { %v1622_v52 = vpop.eup %1621 }
 0x72c   :  { %v678_v54 = vmul.f32 %v1622_v52, %v669_v53  ;;  %v957_v52 = vld [vmem:[#allocation6 + $0x10] sm:$0xff]  ;;  %v956_v53 = vld [vmem:[#allocation6 + $0x8] sm:$0xff] }
 0x72e   :  { %1486 = vmatmul.mubr.f32.vlgmr.msra.gmra.mxu0 %v678_v54 }
 0x72f   :  { %1524 = vmatpush3.msra.mxu0 %v1756_v3  ;;  %1555 = vmatprep.mubr.msk.f32.mxu0 %vm1705_vm0, %v1704_v0  ;;  %v187_v3 = vadd.f32 %v1968_v5, %v1899_v38  ;;  %v961_v38 = vld [vmem:[#allocation6 + $0x30] sm:$0xff] }
 0x730   :  { %1525 = vmatprep.subr.mxu0 %v1704_v0 }
 0x731   :  { %1526 = vmatpush3.msra.mxu0 %v1759_v4 }
 0x732   :  { %1527 = vmatprep.subr.mxu0 %v1704_v0 }
 0x733   :  { %1528 = vmatpush3.msra.mxu0 %v1762_v6 }
 0x734   :  { %1529 = vmatprep.subr.mxu0 %v1704_v0 }
 0x735   :  { %1530 = vmatpush3.msra.mxu0 %v1766_v8 }
 0x736   :  { %1531 = vmatprep.subr.mxu0 %v1704_v0 }
 0x737   :  { %1532 = vmatpush3.msra.mxu0 %v1770_v10 }
 0x738   :  { %1533 = vmatprep.subr.mxu0 %v1704_v0 }
 0x739   :  { %1534 = vmatpush3.msra.mxu0 %v1774_v12 }
 0x73a   :  { %1535 = vmatprep.subr.mxu0 %v1704_v0 }
 0x73b   :  { %1536 = vmatpush3.msra.mxu0 %v1778_v14 }
 0x73c   :  { %1537 = vmatprep.subr.mxu0 %v1704_v0 }
 0x73d   :  { %1538 = vmatpush3.msra.mxu0 %v1782_v16 }
 0x73e   :  { %1539 = vmatprep.subr.mxu0 %v1704_v0 }
 0x73f   :  { %1540 = vmatpush3.msra.mxu0 %v1786_v18 }
 0x740   :  { %1541 = vmatprep.subr.mxu0 %v1704_v0 }
 0x741   :  { %1542 = vmatpush3.msra.mxu0 %v1790_v20 }
 0x742   :  { %1543 = vmatprep.subr.mxu0 %v1704_v0 }
 0x743   :  { %1544 = vmatpush3.msra.mxu0 %v1794_v22 }
 0x744   :  { %1545 = vmatprep.subr.mxu0 %v1704_v0 }
 0x745   :  { %1546 = vmatpush3.msra.mxu0 %v1798_v24 }
 0x746   :  { %1547 = vmatprep.subr.mxu0 %v1704_v0 }
 0x747   :  { %1548 = vmatpush3.msra.mxu0 %v1802_v26 }
 0x748   :  { %1549 = vmatprep.subr.mxu0 %v1704_v0 }
 0x749   :  { %1550 = vmatpush3.msra.mxu0 %v1806_v28 }
 0x74a   :  { %1551 = vmatprep.subr.mxu0 %v1704_v0 }
 0x74b   :  { %1552 = vmatpush3.msra.mxu0 %v1814_v31 }
 0x74c   :  { %1553 = vmatprep.subr.mxu0 %v1704_v0 }
 0x74d   :  { %1554 = vmatpush3.msra.mxu0 %v1817_v33 }
 0x7ee   :  { %v745_v4 = vpop.f32.mrf.mxu0 }
 0x7ef   :  { %v749_v6 = vadd.f32 %v745_v4, %v187_v3 }
 0x7f0   :  { %v1487_v8 = vpop.f32.mrf.mxu0 }
 0x7f1   :  { %v750_v10 = vmul.f32 0.5, %v749_v6 }
 0x7f3   :  { %v751_v12 = vsel %vm202_vm1, %v750_v10, %v749_v6 }
 0x7f4   :  { %1623 = vtanh.f32 %v751_v12 }
 0x801   :  { %v1624_v14 = vpop.eup %1623 }
 0x802   :  { %v753_v16 = vmul.f32 0.5, %v1624_v14 }
 0x804   :  { %v754_v18 = vadd.f32 0.5, %v753_v16  ;;  %v1056_v16 = vld [vmem:[%s2205_s5] ss:$0 sm:$0xff] }
 0x806   :  { %v755_v20 = vsel %vm202_vm1, %v754_v18, %v1624_v14 }
 0x807   :  { %763 = vrot.lane.b32.xlu0 %v755_v20, %s1708_s30  ;;  %757 = vrot.lane.b32.xlu1 %v755_v20, %s1707_s27 }
 0x80b   :  { %760 = vrot.lane.b32.xlu1 %v755_v20, %s1706_s26 }
 0x879   :  { %v764_v22 = vpop.permute.xlu0 %763  ;;  %v758_v24 = vpop.permute.xlu1 %757 }
 0x87a   :  { %v767_v26 = vmul.f32 %v764_v22, %v755_v20  ;;  %v766_v28 = vmul.f32 %v758_v24, %v676_v51  ;;  %v958_v51 = vld [vmem:[#allocation6 + $0x18] sm:$0xff] }
 0x87c   :  { %v768_v31 = vadd.f32 %v767_v26, %v766_v28 }
 0x87d   :  { %v761_v5 = vpop.permute.xlu1 %760 }
 0x87e   :  { %1625 = vtanh.f32 %v768_v31 }
 0x88b   :  { %v1626_v33 = vpop.eup %1625 }
 0x88c   :  { %v770_v55 = vmul.f32 %v1626_v33, %v761_v5 }
 0x88e   :  { %1521 = vmatmul.mubr.f32.vlgmr.msra.gmra.mxu1 %v770_v55 }
 0x88f   :  { %1590 = vmatprep.mubr.msk.f32.mxu1 %vm1705_vm0, %v1704_v0  ;;  %1559 = vmatpush3.msra.mxu1 %v970_v27 }
 0x890   :  { %1560 = vmatprep.subr.mxu1 %v1704_v0 }
 0x891   :  { %1561 = vmatpush3.msra.mxu1 %v969_v29 }
 0x892   :  { %1562 = vmatprep.subr.mxu1 %v1704_v0 }
 0x893   :  { %1563 = vmatpush3.msra.mxu1 %v968_v30 }
 0x894   :  { %1564 = vmatprep.subr.mxu1 %v1704_v0 }
 0x895   :  { %1565 = vmatpush3.msra.mxu1 %v967_v32 }
 0x896   :  { %1566 = vmatprep.subr.mxu1 %v1704_v0 }
 0x897   :  { %1567 = vmatpush3.msra.mxu1 %v966_v34 }
 0x898   :  { %1568 = vmatprep.subr.mxu1 %v1704_v0 }
 0x899   :  { %1569 = vmatpush3.msra.mxu1 %v965_v35 }
 0x89a   :  { %1570 = vmatprep.subr.mxu1 %v1704_v0 }
 0x89b   :  { %1571 = vmatpush3.msra.mxu1 %v964_v44 }
 0x89c   :  { %1572 = vmatprep.subr.mxu1 %v1704_v0 }
 0x89d   :  { %1573 = vmatpush3.msra.mxu1 %v963_v45 }
 0x89e   :  { %1574 = vmatprep.subr.mxu1 %v1704_v0 }
 0x89f   :  { %1575 = vmatpush3.msra.mxu1 %v962_v46 }
 0x8a0   :  { %1576 = vmatprep.subr.mxu1 %v1704_v0 }
 0x8a1   :  { %1577 = vmatpush3.msra.mxu1 %v961_v38 }
 0x8a2   :  { %1578 = vmatprep.subr.mxu1 %v1704_v0 }
 0x8a3   :  { %1579 = vmatpush3.msra.mxu1 %v960_v7 }
 0x8a4   :  { %1580 = vmatprep.subr.mxu1 %v1704_v0 }
 0x8a5   :  { %1581 = vmatpush3.msra.mxu1 %v959_v49 }
 0x8a6   :  { %1582 = vmatprep.subr.mxu1 %v1704_v0 }
 0x8a7   :  { %1583 = vmatpush3.msra.mxu1 %v958_v51 }
 0x8a8   :  { %1584 = vmatprep.subr.mxu1 %v1704_v0 }
 0x8a9   :  { %1585 = vmatpush3.msra.mxu1 %v957_v52 }
 0x8aa   :  { %1586 = vmatprep.subr.mxu1 %v1704_v0 }
 0x8ab   :  { %1587 = vmatpush3.msra.mxu1 %v956_v53 }
 0x8ac   :  { %1588 = vmatprep.subr.mxu1 %v1704_v0 }
 0x8ad   :  { %1589 = vmatpush3.msra.mxu1 %v955_v40 }
 0x94e   :  { %v837_v57 = vpop.f32.mrf.mxu1 }
 0x94f   :  { %v841_v58 = vadd.f32 %v837_v57, %v192_v56 }
 0x950   :  { %v1522_v59 = vpop.f32.mrf.mxu1 }
 0x951   :  { %v842_v60 = vmul.f32 0.5, %v841_v58 }
 0x953   :  { %v843_v61 = vsel %vm202_vm1, %v842_v60, %v841_v58 }
 0x954   :  { %1627 = vtanh.f32 %v843_v61 }
 0x961   :  { %v1628_v62 = vpop.eup %1627 }
 0x962   :  { %v845_v63 = vmul.f32 0.5, %v1628_v62 }
 0x964   :  { %v846_v2 = vadd.f32 0.5, %v845_v63 }
 0x966   :  { %v847_v13 = vsel %vm202_vm1, %v846_v2, %v1628_v62 }
 0x967   :  { %855 = vrot.lane.b32.xlu1 %v847_v13, %s1708_s30  ;;  %849 = vrot.lane.b32.xlu0 %v847_v13, %s1707_s27 }
 0x96b   :  { %852 = vrot.lane.b32.xlu0 %v847_v13, %s1706_s26 }
 0x9d9   :  { %v856_v11 = vpop.permute.xlu1 %855  ;;  %v850_v15 = vpop.permute.xlu0 %849 }
 0x9da   :  { %v859_v17 = vmul.f32 %v856_v11, %v847_v13  ;;  %v858_v19 = vmul.f32 %v850_v15, %v768_v31 }
 0x9dc   :  { %v2166_v21 = vadd.f32 %v859_v17, %v858_v19 }
 0x9dd   :  { %v853_v1 = vpop.permute.xlu0 %852 }
 0x9de   :  { %1629 = vtanh.f32 %v2166_v21 }
 0x9eb   :  { %v1630_v23 = vpop.eup %1629 }
 0x9ec   :  { %v862_v25 = vmul.f32 %v1630_v23, %v853_v1 }
 0x9ee   :  { %1556 = vmatmul.mubr.f32.vlgmr.msra.gmra.mxu0 %v862_v25 }
 0xaae   :  { %v929_v37 = vpop.f32.mrf.mxu0 }
 0xaaf   :  { %v933_v39 = vadd.f32 %v929_v37, %v197_v36 }
 0xab0   :  { %v1557_v41 = vpop.f32.mrf.mxu0 }
 0xab1   :  { %v934_v42 = vmul.f32 0.5, %v933_v39 }
 0xab3   :  { %v935_v43 = vsel %vm202_vm1, %v934_v42, %v933_v39 }
 0xab4   :  { %1631 = vtanh.f32 %v935_v43 }
 0xac1   :  { %v1632_v9 = vpop.eup %1631 }
 0xac2   :  { %v937_v47 = vmul.f32 0.5, %v1632_v9 }
 0xac4   :  { %v938_v48 = vadd.f32 0.5, %v937_v47 }
 0xac6   :  { %v939_v50 = vsel %vm202_vm1, %v938_v48, %v1632_v9 }
 0xac7   :  { %947 = vrot.lane.b32.xlu0 %v939_v50, %s1708_s30  ;;  %941 = vrot.lane.b32.xlu1 %v939_v50, %s1707_s27 }
 0xacb   :  { %944 = vrot.lane.b32.xlu1 %v939_v50, %s1706_s26 }
 0xb39   :  { %v948_v54 = vpop.permute.xlu0 %947  ;;  %v942_v3 = vpop.permute.xlu1 %941 }
 0xb3a   :  { %v951_v4 = vmul.f32 %v948_v54, %v939_v50  ;;  %v950_v6 = vmul.f32 %v942_v3, %v2166_v21 }
 0xb3c   :  { %v952_v8 = vadd.f32 %v951_v4, %v950_v6 }
 0xb3d   :  { %v945_v12 = vpop.permute.xlu1 %944 }
 0xb3e   :  { %1633 = vtanh.f32 %v952_v8 }
 0xb4b   :  { %v1634_v10 = vpop.eup %1633 }
 0xb4c   :  { %v954_v14 = vmul.f32 %v1634_v10, %v945_v12 }
 0xb4e   :  { %1591 = vmatmul.mubr.f32.vlgmr.msra.gmra.mxu1 %v954_v14 }
 0xc0e   :  { %v1044_v18 = vpop.f32.mrf.mxu1 }
 0xc0f   :  { %v1045_v20 = vadd.f32 %v1056_v16, %v1044_v18 }
 0xc10   :  { %v1592_v22 = vpop.f32.mrf.mxu1 }
 0xc11   :  { %1048 = vst [vmem:[%s2206_s6] sm:$0xff] %v1045_v20 }
 0xc12   :  { %1053 = vsyncpa [#allocation3], 1 }
 0xc13   :  { %1054 = vsyncpa [#allocation5], 1 }

</bundles_post_ra>
